<compile_context>
chip_gen: v7x
topology: tpu7x:2x2x1
jax: 0.10.0
libtpu: 0.0.40
codegen_flags: <defaults>
</compile_context>

<pallas_src>
import jax
import jax.numpy as jnp
from jax.experimental import pallas as pl
from jax.experimental.pallas import tpu as pltpu


# ----------------------------------------------------------------------------
# Kernel 1: GRU weight evolution (tiny, strictly sequential).
#   gi_* : (T, 1, D) input-gate pre-activations (b_ih already folded in)
#   whh  : (3, D, D) hidden-gate weights, pre-transposed so h @ whh[g]
#   bhh  : (3, 1, D) hidden-gate biases (b_hn must stay inside the r-multiply)
# ----------------------------------------------------------------------------
def gru_kernel(gi_r_ref, gi_z_ref, gi_n_ref, h0_ref, whh_ref, bhh_ref, w_ref):
    T = gi_r_ref.shape[0]
    # Hoist loop-invariant parameters once.
    whh_r = whh_ref[0]
    whh_z = whh_ref[1]
    whh_n = whh_ref[2]
    bhh_r = bhh_ref[0]
    bhh_z = bhh_ref[1]
    bhh_n = bhh_ref[2]

    def step(t, h):
        # Three separate (D,D) matmuls: avoids unaligned lane slicing of a
        # concatenated (D,3D) gate block when D is not a multiple of 128.
        gh_r = jnp.dot(h, whh_r, preferred_element_type=jnp.float32) + bhh_r
        gh_z = jnp.dot(h, whh_z, preferred_element_type=jnp.float32) + bhh_z
        gh_n = jnp.dot(h, whh_n, preferred_element_type=jnp.float32) + bhh_n
        r = jax.nn.sigmoid(gi_r_ref[t] + gh_r)
        z = jax.nn.sigmoid(gi_z_ref[t] + gh_z)
        n = jnp.tanh(gi_n_ref[t] + r * gh_n)
        h_new = (1.0 - z) * n + z * h
        w_ref[t] = h_new.astype(w_ref.dtype)
        return h_new

    # Bounded unroll: full scheduler visibility for short T without exploding
    # vreg live ranges / compile time for long sequences.
    jax.lax.fori_loop(0, T, step, h0_ref[...], unroll=min(T, 4))


def evolve_weights(gi_r, gi_z, gi_n, w0, whh, bhh):
    T, _, D = gi_r.shape
    return pl.pallas_call(
        gru_kernel,
        out_shape=jax.ShapeDtypeStruct((T, D, D), jnp.float32),
    )(gi_r, gi_z, gi_n, w0, whh, bhh)


# ----------------------------------------------------------------------------
# Kernel 2: fused GCN path.
#   out_flat = relu((A_hat @ X_flat) @ block_diag(W_0..W_{T-1}))
# Row-tiled over A_hat rows ("parallel"), K-tiled over the contraction
# (node) axis ("arbitrary") with an f32 VMEM accumulator.  bf16 MXU inputs,
# lane-dense (N, T*D) output -> unmasked vector stores.
# ----------------------------------------------------------------------------
def gcn_fused_kernel(a_ref, xf_ref, wblk_ref, o_ref, acc_ref):
    @pl.when(pl.program_id(1) == 0)
    def _():
        acc_ref[...] = jnp.zeros_like(acc_ref)

    acc_ref[...] += jnp.dot(a_ref[...], xf_ref[...],
                            preferred_element_type=jnp.float32)

    @pl.when(pl.program_id(1) == pl.num_programs(1) - 1)
    def _():
        # (AX_tile) @ block_diag(W_t) == per-timestep (A X_t) @ W_t, fused so
        # the (T, N, D) intermediate never round-trips HBM.
        xw = jnp.dot(acc_ref[...], wblk_ref[...],
                     preferred_element_type=jnp.float32)
        o_ref[...] = jnp.maximum(xw, 0.0).astype(o_ref.dtype)


def fused_gcn(a_hat_bf16, x_flat_bf16, w_blkdiag, *, row_tile=None, k_tile=None):
    """a_hat: (N, N) bf16; x_flat: (N, T*D) bf16; w_blkdiag: (T*D, T*D) f32."""
    N, TD = x_flat_bf16.shape
    # Row tile / contraction tile: largest that keeps double-buffered tiles
    # comfortably inside VMEM on all generations (v7x has only 64 MiB).
    tn = row_tile if row_tile is not None else min(N, 256)
    tk = k_tile if k_tile is not None else min(N, 1024)
    assert N % tn == 0 and N % tk == 0, "node count must divide the tile sizes"

    # Explicit VMEM budget: double-buffered in/out tiles + weights + accumulator.
    need = (2 * (tn * tk * 2 + tk * TD * 2 + tn * TD * 4)
            + TD * TD * 4 + tn * TD * 4)
    vmem_limit = min(max(2 * need, 32 << 20), 96 << 20)

    return pl.pallas_call(
        gcn_fused_kernel,
        out_shape=jax.ShapeDtypeStruct((N, TD), jnp.float32),
        grid=(N // tn, N // tk),
        in_specs=[
            pl.BlockSpec((tn, tk), lambda i, k: (i, k)),   # A_hat tile (bf16)
            pl.BlockSpec((tk, TD), lambda i, k: (k, 0)),   # X_flat tile (bf16)
            pl.BlockSpec((TD, TD), lambda i, k: (0, 0)),   # block-diag W (f32)
        ],
        out_specs=pl.BlockSpec((tn, TD), lambda i, k: (i, 0)),
        scratch_shapes=[pltpu.VMEM((tn, TD), jnp.float32)],
        compiler_params=pltpu.CompilerParams(
            dimension_semantics=("parallel", "arbitrary"),
            vmem_limit_bytes=vmem_limit,
        ),
    )(a_hat_bf16, x_flat_bf16, w_blkdiag)


# ----------------------------------------------------------------------------
# EvolveGCN-H forward (cheap glue in plain JAX, hot paths in Pallas).
# ----------------------------------------------------------------------------
@jax.jit
def evolve_gcn_h_forward(x, a_hat, w0, wih, whh, bih, bhh):
    T, N, D = x.shape
    # Summarizer: mean over nodes (rank-1 rows -> input-gate GEMM hoistable).
    summary = jnp.mean(x, axis=1)                                      # (T, D)
    # Per-gate input pre-activations for all timesteps at once (b_ih folded).
    gi = jnp.einsum('td,gde->gte', summary, wih) + bih                 # (3, T, D)
    gi = gi[:, :, None, :]                                             # (3, T, 1, D)

    # 1) Tiny sequential GRU weight evolution.
    wseq = evolve_weights(gi[0], gi[1], gi[2], w0, whh, bhh)           # (T, D, D)

    # 2) Block-diagonal weights so the GCN multiply fuses into the big GEMM.
    # TODO(synk): for very long sequences, tile the second GEMM over t instead
    # of materializing the (T*D, T*D) block-diagonal matrix.
    eye_t = jnp.eye(T, dtype=wseq.dtype)
    w_blk = eye_t[:, :, None, None] * wseq[:, None, :, :]              # (T, T, D, D)
    w_blk = jnp.transpose(w_blk, (0, 2, 1, 3)).reshape(T * D, T * D)

    # 3) One fused, tiled, bf16-input GEMM for the whole GCN path.
    x_flat = jnp.transpose(x, (1, 0, 2)).reshape(N, T * D)             # (N, T*D)
    out_flat = fused_gcn(a_hat.astype(jnp.bfloat16),
                         x_flat.astype(jnp.bfloat16), w_blk)           # (N, T*D)
    out = jnp.transpose(out_flat.reshape(N, T, D), (1, 0, 2))          # (T, N, D)
    return out, wseq


# ----------------------------------------------------------------------------
# Pure-JAX reference (for correctness check).
# ----------------------------------------------------------------------------
def reference_forward(x, a_hat, w0, wih, whh, bih, bhh):
    T, N, D = x.shape
    h = w0
    outs, ws = [], []
    for t in range(T):
        s = jnp.mean(x[t], axis=0)
        xt = jnp.broadcast_to(s[None, :], (D, D))
        gi = [xt @ wih[g] + bih[g] for g in range(3)]
        gh = [h @ whh[g] + bhh[g] for g in range(3)]
        r = jax.nn.sigmoid(gi[0] + gh[0])
        z = jax.nn.sigmoid(gi[1] + gh[1])
        n = jnp.tanh(gi[2] + r * gh[2])
        h = (1.0 - z) * n + z * h
        ws.append(h)
        outs.append(jnp.maximum((a_hat @ x[t]) @ h, 0.0))
    return jnp.stack(outs), jnp.stack(ws)


if __name__ == "__main__":
    key = jax.random.PRNGKey(0)
    D = 32      # input_d (GRU input == hidden == GCN feature dim)
    N = 64      # number of graph nodes
    T = 4       # number of timesteps

    k = jax.random.split(key, 8)

    # Node features per timestep.
    x = jax.random.normal(k[0], (T, N, D), dtype=jnp.float32)

    # Random symmetric adjacency + self loops, symmetric normalization.
    a_rand = (jax.random.uniform(k[1], (N, N)) < 0.1).astype(jnp.float32)
    a = jnp.maximum(a_rand, a_rand.T)
    a = a + jnp.eye(N, dtype=jnp.float32)
    deg = jnp.sum(a, axis=1)
    dinv = jax.lax.rsqrt(deg)
    a_hat = a * dinv[:, None] * dinv[None, :]

    # Deterministic parameter init (nn.GRU(D, D) param shapes, gate order r,z,n).
    scale = 1.0 / jnp.sqrt(jnp.float32(D))
    # Stored pre-transposed per gate: (3, D, D) so that x @ W^T == x @ wih[g].
    wih = jax.random.uniform(k[2], (3, D, D), minval=-scale, maxval=scale).astype(jnp.float32)
    whh = jax.random.uniform(k[3], (3, D, D), minval=-scale, maxval=scale).astype(jnp.float32)
    bih = jax.random.uniform(k[4], (3, 1, D), minval=-scale, maxval=scale).astype(jnp.float32)
    bhh = jax.random.uniform(k[5], (3, 1, D), minval=-scale, maxval=scale).astype(jnp.float32)
    # Initial GCN weight (= GRU h0), Glorot-ish.
    w0 = jax.random.normal(k[6], (D, D), dtype=jnp.float32) * scale

    out, wseq = evolve_gcn_h_forward(x, a_hat, w0, wih, whh, bih, bhh)
    out = jax.block_until_ready(out)
    wseq = jax.block_until_ready(wseq)

    ref_out, ref_w = reference_forward(x, a_hat, w0, wih, whh, bih, bhh)
    # Evolved weights are a pure-f32 path -> tight tolerance.
    assert jnp.allclose(wseq, ref_w, atol=1e-3, rtol=1e-3), "evolved weights mismatch"
    # GCN output uses bf16 GEMM inputs (f32 accumulation) -> looser tolerance.
    assert jnp.allclose(out, ref_out, atol=2e-2, rtol=2e-2), "GCN output mismatch"

    print("KERNEL_OK")
</pallas_src>

<mosaic_0001>
module attributes {stable_mosaic.version = 11 : i64} {
  func.func @gru_kernel(%arg0: memref<4x1x32xf32, #tpu.memory_space<vmem>>, %arg1: memref<4x1x32xf32, #tpu.memory_space<vmem>>, %arg2: memref<4x1x32xf32, #tpu.memory_space<vmem>>, %arg3: memref<32x32xf32, #tpu.memory_space<vmem>>, %arg4: memref<3x32x32xf32, #tpu.memory_space<vmem>>, %arg5: memref<3x1x32xf32, #tpu.memory_space<vmem>>, %arg6: memref<4x32x32xf32, #tpu.memory_space<vmem>>) attributes {dimension_semantics = [], scalar_prefetch = 0 : i64, scratch_operands = 0 : i64, tpu.core_type = #tpu.core_type<tc>} {
    %c0 = arith.constant 0 : index
    %c0_0 = arith.constant 0 : index
    %c0_1 = arith.constant 0 : index
    %0 = vector.load %arg4[%c0, %c0_0, %c0_1] : memref<3x32x32xf32, #tpu.memory_space<vmem>>, vector<1x32x32xf32>
    %1 = vector.shape_cast %0 : vector<1x32x32xf32> to vector<32x32xf32>
    %c1 = arith.constant 1 : index
    %c0_2 = arith.constant 0 : index
    %c0_3 = arith.constant 0 : index
    %2 = vector.load %arg4[%c1, %c0_2, %c0_3] : memref<3x32x32xf32, #tpu.memory_space<vmem>>, vector<1x32x32xf32>
    %3 = vector.shape_cast %2 : vector<1x32x32xf32> to vector<32x32xf32>
    %c2 = arith.constant 2 : index
    %c0_4 = arith.constant 0 : index
    %c0_5 = arith.constant 0 : index
    %4 = vector.load %arg4[%c2, %c0_4, %c0_5] : memref<3x32x32xf32, #tpu.memory_space<vmem>>, vector<1x32x32xf32>
    %5 = vector.shape_cast %4 : vector<1x32x32xf32> to vector<32x32xf32>
    %c0_6 = arith.constant 0 : index
    %c0_7 = arith.constant 0 : index
    %c0_8 = arith.constant 0 : index
    %6 = vector.load %arg5[%c0_6, %c0_7, %c0_8] : memref<3x1x32xf32, #tpu.memory_space<vmem>>, vector<1x1x32xf32>
    %7 = vector.shape_cast %6 : vector<1x1x32xf32> to vector<1x32xf32>
    %c1_9 = arith.constant 1 : index
    %c0_10 = arith.constant 0 : index
    %c0_11 = arith.constant 0 : index
    %8 = vector.load %arg5[%c1_9, %c0_10, %c0_11] : memref<3x1x32xf32, #tpu.memory_space<vmem>>, vector<1x1x32xf32>
    %9 = vector.shape_cast %8 : vector<1x1x32xf32> to vector<1x32xf32>
    %c2_12 = arith.constant 2 : index
    %c0_13 = arith.constant 0 : index
    %c0_14 = arith.constant 0 : index
    %10 = vector.load %arg5[%c2_12, %c0_13, %c0_14] : memref<3x1x32xf32, #tpu.memory_space<vmem>>, vector<1x1x32xf32>
    %11 = vector.shape_cast %10 : vector<1x1x32xf32> to vector<1x32xf32>
    %c0_15 = arith.constant 0 : index
    %c0_16 = arith.constant 0 : index
    %12 = vector.load %arg3[%c0_15, %c0_16] : memref<32x32xf32, #tpu.memory_space<vmem>>, vector<32x32xf32>
    %c0_i32 = arith.constant 0 : i32
    %cst = arith.constant dense<0.000000e+00> : vector<32x32xf32>
    %13 = tpu.matmul %12, %1, %cst {dimension_numbers = #tpu.dot_dimension_numbers<[1], [0], [0], [1], [0, 0, 1, 1], [], []>} : vector<32x32xf32>, vector<32x32xf32>, vector<32x32xf32> -> vector<32x32xf32>
    %14 = vector.broadcast %7 : vector<1x32xf32> to vector<32x32xf32>
    %15 = arith.addf %13, %14 : vector<32x32xf32>
    %cst_17 = arith.constant dense<0.000000e+00> : vector<32x32xf32>
    %16 = tpu.matmul %12, %3, %cst_17 {dimension_numbers = #tpu.dot_dimension_numbers<[1], [0], [0], [1], [0, 0, 1, 1], [], []>} : vector<32x32xf32>, vector<32x32xf32>, vector<32x32xf32> -> vector<32x32xf32>
    %17 = vector.broadcast %9 : vector<1x32xf32> to vector<32x32xf32>
    %18 = arith.addf %16, %17 : vector<32x32xf32>
    %cst_18 = arith.constant dense<0.000000e+00> : vector<32x32xf32>
    %19 = tpu.matmul %12, %5, %cst_18 {dimension_numbers = #tpu.dot_dimension_numbers<[1], [0], [0], [1], [0, 0, 1, 1], [], []>} : vector<32x32xf32>, vector<32x32xf32>, vector<32x32xf32> -> vector<32x32xf32>
    %20 = vector.broadcast %11 : vector<1x32xf32> to vector<32x32xf32>
    %21 = arith.addf %19, %20 : vector<32x32xf32>
    %22 = arith.index_cast %c0_i32 : i32 to index
    %c0_19 = arith.constant 0 : index
    %c0_20 = arith.constant 0 : index
    %23 = vector.load %arg0[%22, %c0_19, %c0_20] : memref<4x1x32xf32, #tpu.memory_space<vmem>>, vector<1x1x32xf32>
    %24 = vector.shape_cast %23 : vector<1x1x32xf32> to vector<1x32xf32>
    %25 = vector.broadcast %24 : vector<1x32xf32> to vector<32x32xf32>
    %26 = arith.addf %25, %15 : vector<32x32xf32>
    %27 = arith.negf %26 : vector<32x32xf32>
    %28 = math.exp %27 : vector<32x32xf32>
    %cst_21 = arith.constant 1.000000e+00 : f32
    %29 = vector.broadcast %cst_21 : f32 to vector<32x32xf32>
    %30 = arith.addf %29, %28 : vector<32x32xf32>
    %31 = arith.divf %29, %30 : vector<32x32xf32>
    %32 = arith.index_cast %c0_i32 : i32 to index
    %c0_22 = arith.constant 0 : index
    %c0_23 = arith.constant 0 : index
    %33 = vector.load %arg1[%32, %c0_22, %c0_23] : memref<4x1x32xf32, #tpu.memory_space<vmem>>, vector<1x1x32xf32>
    %34 = vector.shape_cast %33 : vector<1x1x32xf32> to vector<1x32xf32>
    %35 = vector.broadcast %34 : vector<1x32xf32> to vector<32x32xf32>
    %36 = arith.addf %35, %18 : vector<32x32xf32>
    %37 = arith.negf %36 : vector<32x32xf32>
    %38 = math.exp %37 : vector<32x32xf32>
    %cst_24 = arith.constant 1.000000e+00 : f32
    %39 = vector.broadcast %cst_24 : f32 to vector<32x32xf32>
    %40 = arith.addf %39, %38 : vector<32x32xf32>
    %41 = arith.divf %39, %40 : vector<32x32xf32>
    %42 = arith.index_cast %c0_i32 : i32 to index
    %c0_25 = arith.constant 0 : index
    %c0_26 = arith.constant 0 : index
    %43 = vector.load %arg2[%42, %c0_25, %c0_26] : memref<4x1x32xf32, #tpu.memory_space<vmem>>, vector<1x1x32xf32>
    %44 = vector.shape_cast %43 : vector<1x1x32xf32> to vector<1x32xf32>
    %45 = arith.mulf %31, %21 : vector<32x32xf32>
    %46 = vector.broadcast %44 : vector<1x32xf32> to vector<32x32xf32>
    %47 = arith.addf %46, %45 : vector<32x32xf32>
    %48 = math.tanh %47 : vector<32x32xf32>
    %cst_27 = arith.constant 1.000000e+00 : f32
    %49 = vector.broadcast %cst_27 : f32 to vector<32x32xf32>
    %50 = arith.subf %49, %41 : vector<32x32xf32>
    %51 = arith.mulf %50, %48 : vector<32x32xf32>
    %52 = arith.mulf %41, %12 : vector<32x32xf32>
    %53 = arith.addf %51, %52 : vector<32x32xf32>
    %54 = arith.index_cast %c0_i32 : i32 to index
    %c0_28 = arith.constant 0 : index
    %c0_29 = arith.constant 0 : index
    %55 = vector.load %arg6[%54, %c0_28, %c0_29] : memref<4x32x32xf32, #tpu.memory_space<vmem>>, vector<1x32x32xf32>
    %56 = vector.shape_cast %55 : vector<1x32x32xf32> to vector<32x32xf32>
    %57 = vector.shape_cast %53 : vector<32x32xf32> to vector<1x32x32xf32>
    tpu.vector_store %arg6[%54, %c0_28, %c0_29], %57 {strides = array<i32>} : memref<4x32x32xf32, #tpu.memory_space<vmem>>, vector<1x32x32xf32>,
    %c1_i32 = arith.constant 1 : i32
    %cst_30 = arith.constant dense<0.000000e+00> : vector<32x32xf32>
    %58 = tpu.matmul %53, %1, %cst_30 {dimension_numbers = #tpu.dot_dimension_numbers<[1], [0], [0], [1], [0, 0, 1, 1], [], []>} : vector<32x32xf32>, vector<32x32xf32>, vector<32x32xf32> -> vector<32x32xf32>
    %59 = vector.broadcast %7 : vector<1x32xf32> to vector<32x32xf32>
    %60 = arith.addf %58, %59 : vector<32x32xf32>
    %cst_31 = arith.constant dense<0.000000e+00> : vector<32x32xf32>
    %61 = tpu.matmul %53, %3, %cst_31 {dimension_numbers = #tpu.dot_dimension_numbers<[1], [0], [0], [1], [0, 0, 1, 1], [], []>} : vector<32x32xf32>, vector<32x32xf32>, vector<32x32xf32> -> vector<32x32xf32>
    %62 = vector.broadcast %9 : vector<1x32xf32> to vector<32x32xf32>
    %63 = arith.addf %61, %62 : vector<32x32xf32>
    %cst_32 = arith.constant dense<0.000000e+00> : vector<32x32xf32>
    %64 = tpu.matmul %53, %5, %cst_32 {dimension_numbers = #tpu.dot_dimension_numbers<[1], [0], [0], [1], [0, 0, 1, 1], [], []>} : vector<32x32xf32>, vector<32x32xf32>, vector<32x32xf32> -> vector<32x32xf32>
    %65 = vector.broadcast %11 : vector<1x32xf32> to vector<32x32xf32>
    %66 = arith.addf %64, %65 : vector<32x32xf32>
    %67 = arith.index_cast %c1_i32 : i32 to index
    %c0_33 = arith.constant 0 : index
    %c0_34 = arith.constant 0 : index
    %68 = vector.load %arg0[%67, %c0_33, %c0_34] : memref<4x1x32xf32, #tpu.memory_space<vmem>>, vector<1x1x32xf32>
    %69 = vector.shape_cast %68 : vector<1x1x32xf32> to vector<1x32xf32>
    %70 = vector.broadcast %69 : vector<1x32xf32> to vector<32x32xf32>
    %71 = arith.addf %70, %60 : vector<32x32xf32>
    %72 = arith.negf %71 : vector<32x32xf32>
    %73 = math.exp %72 : vector<32x32xf32>
    %cst_35 = arith.constant 1.000000e+00 : f32
    %74 = vector.broadcast %cst_35 : f32 to vector<32x32xf32>
    %75 = arith.addf %74, %73 : vector<32x32xf32>
    %76 = arith.divf %74, %75 : vector<32x32xf32>
    %77 = arith.index_cast %c1_i32 : i32 to index
    %c0_36 = arith.constant 0 : index
    %c0_37 = arith.constant 0 : index
    %78 = vector.load %arg1[%77, %c0_36, %c0_37] : memref<4x1x32xf32, #tpu.memory_space<vmem>>, vector<1x1x32xf32>
    %79 = vector.shape_cast %78 : vector<1x1x32xf32> to vector<1x32xf32>
    %80 = vector.broadcast %79 : vector<1x32xf32> to vector<32x32xf32>
    %81 = arith.addf %80, %63 : vector<32x32xf32>
    %82 = arith.negf %81 : vector<32x32xf32>
    %83 = math.exp %82 : vector<32x32xf32>
    %cst_38 = arith.constant 1.000000e+00 : f32
    %84 = vector.broadcast %cst_38 : f32 to vector<32x32xf32>
    %85 = arith.addf %84, %83 : vector<32x32xf32>
    %86 = arith.divf %84, %85 : vector<32x32xf32>
    %87 = arith.index_cast %c1_i32 : i32 to index
    %c0_39 = arith.constant 0 : index
    %c0_40 = arith.constant 0 : index
    %88 = vector.load %arg2[%87, %c0_39, %c0_40] : memref<4x1x32xf32, #tpu.memory_space<vmem>>, vector<1x1x32xf32>
    %89 = vector.shape_cast %88 : vector<1x1x32xf32> to vector<1x32xf32>
    %90 = arith.mulf %76, %66 : vector<32x32xf32>
    %91 = vector.broadcast %89 : vector<1x32xf32> to vector<32x32xf32>
    %92 = arith.addf %91, %90 : vector<32x32xf32>
    %93 = math.tanh %92 : vector<32x32xf32>
    %cst_41 = arith.constant 1.000000e+00 : f32
    %94 = vector.broadcast %cst_41 : f32 to vector<32x32xf32>
    %95 = arith.subf %94, %86 : vector<32x32xf32>
    %96 = arith.mulf %95, %93 : vector<32x32xf32>
    %97 = arith.mulf %86, %53 : vector<32x32xf32>
    %98 = arith.addf %96, %97 : vector<32x32xf32>
    %99 = arith.index_cast %c1_i32 : i32 to index
    %c0_42 = arith.constant 0 : index
    %c0_43 = arith.constant 0 : index
    %100 = vector.load %arg6[%99, %c0_42, %c0_43] : memref<4x32x32xf32, #tpu.memory_space<vmem>>, vector<1x32x32xf32>
    %101 = vector.shape_cast %100 : vector<1x32x32xf32> to vector<32x32xf32>
    %102 = vector.shape_cast %98 : vector<32x32xf32> to vector<1x32x32xf32>
    tpu.vector_store %arg6[%99, %c0_42, %c0_43], %102 {strides = array<i32>} : memref<4x32x32xf32, #tpu.memory_space<vmem>>, vector<1x32x32xf32>,
    %c2_i32 = arith.constant 2 : i32
    %cst_44 = arith.constant dense<0.000000e+00> : vector<32x32xf32>
    %103 = tpu.matmul %98, %1, %cst_44 {dimension_numbers = #tpu.dot_dimension_numbers<[1], [0], [0], [1], [0, 0, 1, 1], [], []>} : vector<32x32xf32>, vector<32x32xf32>, vector<32x32xf32> -> vector<32x32xf32>
    %104 = vector.broadcast %7 : vector<1x32xf32> to vector<32x32xf32>
    %105 = arith.addf %103, %104 : vector<32x32xf32>
    %cst_45 = arith.constant dense<0.000000e+00> : vector<32x32xf32>
    %106 = tpu.matmul %98, %3, %cst_45 {dimension_numbers = #tpu.dot_dimension_numbers<[1], [0], [0], [1], [0, 0, 1, 1], [], []>} : vector<32x32xf32>, vector<32x32xf32>, vector<32x32xf32> -> vector<32x32xf32>
    %107 = vector.broadcast %9 : vector<1x32xf32> to vector<32x32xf32>
    %108 = arith.addf %106, %107 : vector<32x32xf32>
    %cst_46 = arith.constant dense<0.000000e+00> : vector<32x32xf32>
    %109 = tpu.matmul %98, %5, %cst_46 {dimension_numbers = #tpu.dot_dimension_numbers<[1], [0], [0], [1], [0, 0, 1, 1], [], []>} : vector<32x32xf32>, vector<32x32xf32>, vector<32x32xf32> -> vector<32x32xf32>
    %110 = vector.broadcast %11 : vector<1x32xf32> to vector<32x32xf32>
    %111 = arith.addf %109, %110 : vector<32x32xf32>
    %112 = arith.index_cast %c2_i32 : i32 to index
    %c0_47 = arith.constant 0 : index
    %c0_48 = arith.constant 0 : index
    %113 = vector.load %arg0[%112, %c0_47, %c0_48] : memref<4x1x32xf32, #tpu.memory_space<vmem>>, vector<1x1x32xf32>
    %114 = vector.shape_cast %113 : vector<1x1x32xf32> to vector<1x32xf32>
    %115 = vector.broadcast %114 : vector<1x32xf32> to vector<32x32xf32>
    %116 = arith.addf %115, %105 : vector<32x32xf32>
    %117 = arith.negf %116 : vector<32x32xf32>
    %118 = math.exp %117 : vector<32x32xf32>
    %cst_49 = arith.constant 1.000000e+00 : f32
    %119 = vector.broadcast %cst_49 : f32 to vector<32x32xf32>
    %120 = arith.addf %119, %118 : vector<32x32xf32>
    %121 = arith.divf %119, %120 : vector<32x32xf32>
    %122 = arith.index_cast %c2_i32 : i32 to index
    %c0_50 = arith.constant 0 : index
    %c0_51 = arith.constant 0 : index
    %123 = vector.load %arg1[%122, %c0_50, %c0_51] : memref<4x1x32xf32, #tpu.memory_space<vmem>>, vector<1x1x32xf32>
    %124 = vector.shape_cast %123 : vector<1x1x32xf32> to vector<1x32xf32>
    %125 = vector.broadcast %124 : vector<1x32xf32> to vector<32x32xf32>
    %126 = arith.addf %125, %108 : vector<32x32xf32>
    %127 = arith.negf %126 : vector<32x32xf32>
    %128 = math.exp %127 : vector<32x32xf32>
    %cst_52 = arith.constant 1.000000e+00 : f32
    %129 = vector.broadcast %cst_52 : f32 to vector<32x32xf32>
    %130 = arith.addf %129, %128 : vector<32x32xf32>
    %131 = arith.divf %129, %130 : vector<32x32xf32>
    %132 = arith.index_cast %c2_i32 : i32 to index
    %c0_53 = arith.constant 0 : index
    %c0_54 = arith.constant 0 : index
    %133 = vector.load %arg2[%132, %c0_53, %c0_54] : memref<4x1x32xf32, #tpu.memory_space<vmem>>, vector<1x1x32xf32>
    %134 = vector.shape_cast %133 : vector<1x1x32xf32> to vector<1x32xf32>
    %135 = arith.mulf %121, %111 : vector<32x32xf32>
    %136 = vector.broadcast %134 : vector<1x32xf32> to vector<32x32xf32>
    %137 = arith.addf %136, %135 : vector<32x32xf32>
    %138 = math.tanh %137 : vector<32x32xf32>
    %cst_55 = arith.constant 1.000000e+00 : f32
    %139 = vector.broadcast %cst_55 : f32 to vector<32x32xf32>
    %140 = arith.subf %139, %131 : vector<32x32xf32>
    %141 = arith.mulf %140, %138 : vector<32x32xf32>
    %142 = arith.mulf %131, %98 : vector<32x32xf32>
    %143 = arith.addf %141, %142 : vector<32x32xf32>
    %144 = arith.index_cast %c2_i32 : i32 to index
    %c0_56 = arith.constant 0 : index
    %c0_57 = arith.constant 0 : index
    %145 = vector.load %arg6[%144, %c0_56, %c0_57] : memref<4x32x32xf32, #tpu.memory_space<vmem>>, vector<1x32x32xf32>
    %146 = vector.shape_cast %145 : vector<1x32x32xf32> to vector<32x32xf32>
    %147 = vector.shape_cast %143 : vector<32x32xf32> to vector<1x32x32xf32>
    tpu.vector_store %arg6[%144, %c0_56, %c0_57], %147 {strides = array<i32>} : memref<4x32x32xf32, #tpu.memory_space<vmem>>, vector<1x32x32xf32>,
    %c3_i32 = arith.constant 3 : i32
    %cst_58 = arith.constant dense<0.000000e+00> : vector<32x32xf32>
    %148 = tpu.matmul %143, %1, %cst_58 {dimension_numbers = #tpu.dot_dimension_numbers<[1], [0], [0], [1], [0, 0, 1, 1], [], []>} : vector<32x32xf32>, vector<32x32xf32>, vector<32x32xf32> -> vector<32x32xf32>
    %149 = vector.broadcast %7 : vector<1x32xf32> to vector<32x32xf32>
    %150 = arith.addf %148, %149 : vector<32x32xf32>
    %cst_59 = arith.constant dense<0.000000e+00> : vector<32x32xf32>
    %151 = tpu.matmul %143, %3, %cst_59 {dimension_numbers = #tpu.dot_dimension_numbers<[1], [0], [0], [1], [0, 0, 1, 1], [], []>} : vector<32x32xf32>, vector<32x32xf32>, vector<32x32xf32> -> vector<32x32xf32>
    %152 = vector.broadcast %9 : vector<1x32xf32> to vector<32x32xf32>
    %153 = arith.addf %151, %152 : vector<32x32xf32>
    %cst_60 = arith.constant dense<0.000000e+00> : vector<32x32xf32>
    %154 = tpu.matmul %143, %5, %cst_60 {dimension_numbers = #tpu.dot_dimension_numbers<[1], [0], [0], [1], [0, 0, 1, 1], [], []>} : vector<32x32xf32>, vector<32x32xf32>, vector<32x32xf32> -> vector<32x32xf32>
    %155 = vector.broadcast %11 : vector<1x32xf32> to vector<32x32xf32>
    %156 = arith.addf %154, %155 : vector<32x32xf32>
    %157 = arith.index_cast %c3_i32 : i32 to index
    %c0_61 = arith.constant 0 : index
    %c0_62 = arith.constant 0 : index
    %158 = vector.load %arg0[%157, %c0_61, %c0_62] : memref<4x1x32xf32, #tpu.memory_space<vmem>>, vector<1x1x32xf32>
    %159 = vector.shape_cast %158 : vector<1x1x32xf32> to vector<1x32xf32>
    %160 = vector.broadcast %159 : vector<1x32xf32> to vector<32x32xf32>
    %161 = arith.addf %160, %150 : vector<32x32xf32>
    %162 = arith.negf %161 : vector<32x32xf32>
    %163 = math.exp %162 : vector<32x32xf32>
    %cst_63 = arith.constant 1.000000e+00 : f32
    %164 = vector.broadcast %cst_63 : f32 to vector<32x32xf32>
    %165 = arith.addf %164, %163 : vector<32x32xf32>
    %166 = arith.divf %164, %165 : vector<32x32xf32>
    %167 = arith.index_cast %c3_i32 : i32 to index
    %c0_64 = arith.constant 0 : index
    %c0_65 = arith.constant 0 : index
    %168 = vector.load %arg1[%167, %c0_64, %c0_65] : memref<4x1x32xf32, #tpu.memory_space<vmem>>, vector<1x1x32xf32>
    %169 = vector.shape_cast %168 : vector<1x1x32xf32> to vector<1x32xf32>
    %170 = vector.broadcast %169 : vector<1x32xf32> to vector<32x32xf32>
    %171 = arith.addf %170, %153 : vector<32x32xf32>
    %172 = arith.negf %171 : vector<32x32xf32>
    %173 = math.exp %172 : vector<32x32xf32>
    %cst_66 = arith.constant 1.000000e+00 : f32
    %174 = vector.broadcast %cst_66 : f32 to vector<32x32xf32>
    %175 = arith.addf %174, %173 : vector<32x32xf32>
    %176 = arith.divf %174, %175 : vector<32x32xf32>
    %177 = arith.index_cast %c3_i32 : i32 to index
    %c0_67 = arith.constant 0 : index
    %c0_68 = arith.constant 0 : index
    %178 = vector.load %arg2[%177, %c0_67, %c0_68] : memref<4x1x32xf32, #tpu.memory_space<vmem>>, vector<1x1x32xf32>
    %179 = vector.shape_cast %178 : vector<1x1x32xf32> to vector<1x32xf32>
    %180 = arith.mulf %166, %156 : vector<32x32xf32>
    %181 = vector.broadcast %179 : vector<1x32xf32> to vector<32x32xf32>
    %182 = arith.addf %181, %180 : vector<32x32xf32>
    %183 = math.tanh %182 : vector<32x32xf32>
    %cst_69 = arith.constant 1.000000e+00 : f32
    %184 = vector.broadcast %cst_69 : f32 to vector<32x32xf32>
    %185 = arith.subf %184, %176 : vector<32x32xf32>
    %186 = arith.mulf %185, %183 : vector<32x32xf32>
    %187 = arith.mulf %176, %143 : vector<32x32xf32>
    %188 = arith.addf %186, %187 : vector<32x32xf32>
    %189 = arith.index_cast %c3_i32 : i32 to index
    %c0_70 = arith.constant 0 : index
    %c0_71 = arith.constant 0 : index
    %190 = vector.load %arg6[%189, %c0_70, %c0_71] : memref<4x32x32xf32, #tpu.memory_space<vmem>>, vector<1x32x32xf32>
    %191 = vector.shape_cast %190 : vector<1x32x32xf32> to vector<32x32xf32>
    %192 = vector.shape_cast %188 : vector<32x32xf32> to vector<1x32x32xf32>
    tpu.vector_store %arg6[%189, %c0_70, %c0_71], %192 {strides = array<i32>} : memref<4x32x32xf32, #tpu.memory_space<vmem>>, vector<1x32x32xf32>,
    %c4_i32 = arith.constant 4 : i32
    return
  }
}

module attributes {stable_mosaic.version = 11 : i64} {
  func.func @gcn_fused_kernel(%arg0: i32, %arg1: i32, %arg2: memref<64x64xbf16, #tpu.memory_space<vmem>>, %arg3: memref<64x128xbf16, #tpu.memory_space<vmem>>, %arg4: memref<128x128xf32, #tpu.memory_space<vmem>>, %arg5: memref<64x128xf32, #tpu.memory_space<vmem>>, %arg6: memref<64x128xf32, #tpu.memory_space<vmem>>) attributes {dimension_semantics = [#tpu.dimension_semantics<parallel>, #tpu.dimension_semantics<arbitrary>], iteration_bounds = array<i64: 1, 1>, scalar_prefetch = 0 : i64, scratch_operands = 1 : i64, tpu.core_type = #tpu.core_type<tc>, window_params = [{transform_indices = @transform_0, window_bounds = array<i64: 64, 64>}, {transform_indices = @transform_1, window_bounds = array<i64: 64, 128>}, {pipeline_mode = #tpu.pipeline_mode<synchronous>, transform_indices = @transform_2, window_bounds = array<i64: 128, 128>}, {transform_indices = @transform_3, window_bounds = array<i64: 64, 128>}]} {
    %c0_i32 = arith.constant 0 : i32
    %0 = arith.cmpi eq, %arg1, %c0_i32 : i32
    %1 = arith.extui %0 : i1 to i32
    %c0_i32_0 = arith.constant 0 : i32
    %2 = arith.cmpi ne, %1, %c0_i32_0 : i32
    scf.if %2 {
      %cst_10 = arith.constant 0.000000e+00 : f32
      %12 = vector.broadcast %cst_10 : f32 to vector<64x128xf32>
      %c0_11 = arith.constant 0 : index
      %c0_12 = arith.constant 0 : index
      %13 = vector.load %arg6[%c0_11, %c0_12] : memref<64x128xf32, #tpu.memory_space<vmem>>, vector<64x128xf32>
      tpu.vector_store %arg6[%c0_11, %c0_12], %12 {strides = array<i32>} : memref<64x128xf32, #tpu.memory_space<vmem>>, vector<64x128xf32>,
    } else {
    }
    %c0 = arith.constant 0 : index
    %c0_1 = arith.constant 0 : index
    %3 = vector.load %arg6[%c0, %c0_1] : memref<64x128xf32, #tpu.memory_space<vmem>>, vector<64x128xf32>
    %c0_2 = arith.constant 0 : index
    %c0_3 = arith.constant 0 : index
    %4 = vector.load %arg2[%c0_2, %c0_3] : memref<64x64xbf16, #tpu.memory_space<vmem>>, vector<64x64xbf16>
    %c0_4 = arith.constant 0 : index
    %c0_5 = arith.constant 0 : index
    %5 = vector.load %arg3[%c0_4, %c0_5] : memref<64x128xbf16, #tpu.memory_space<vmem>>, vector<64x128xbf16>
    %cst = arith.constant dense<0.000000e+00> : vector<64x128xf32>
    %6 = tpu.matmul %4, %5, %cst {dimension_numbers = #tpu.dot_dimension_numbers<[1], [0], [0], [1], [0, 0, 1, 1], [], []>} : vector<64x64xbf16>, vector<64x128xbf16>, vector<64x128xf32> -> vector<64x128xf32>
    %7 = arith.addf %3, %6 : vector<64x128xf32>
    %c0_6 = arith.constant 0 : index
    %c0_7 = arith.constant 0 : index
    %8 = vector.load %arg6[%c0_6, %c0_7] : memref<64x128xf32, #tpu.memory_space<vmem>>, vector<64x128xf32>
    tpu.vector_store %arg6[%c0_6, %c0_7], %7 {strides = array<i32>} : memref<64x128xf32, #tpu.memory_space<vmem>>, vector<64x128xf32>,
    %c0_i32_8 = arith.constant 0 : i32
    %9 = arith.cmpi eq, %arg1, %c0_i32_8 : i32
    %10 = arith.extui %9 : i1 to i32
    %c0_i32_9 = arith.constant 0 : i32
    %11 = arith.cmpi ne, %10, %c0_i32_9 : i32
    scf.if %11 {
      %c0_10 = arith.constant 0 : index
      %c0_11 = arith.constant 0 : index
      %12 = vector.load %arg6[%c0_10, %c0_11] : memref<64x128xf32, #tpu.memory_space<vmem>>, vector<64x128xf32>
      %c0_12 = arith.constant 0 : index
      %c0_13 = arith.constant 0 : index
      %13 = vector.load %arg4[%c0_12, %c0_13] : memref<128x128xf32, #tpu.memory_space<vmem>>, vector<128x128xf32>
      %cst_14 = arith.constant dense<0.000000e+00> : vector<64x128xf32>
      %14 = tpu.matmul %12, %13, %cst_14 {dimension_numbers = #tpu.dot_dimension_numbers<[1], [0], [0], [1], [0, 0, 1, 1], [], []>} : vector<64x128xf32>, vector<128x128xf32>, vector<64x128xf32> -> vector<64x128xf32>
      %cst_15 = arith.constant 0.000000e+00 : f32
      %15 = vector.broadcast %cst_15 : f32 to vector<64x128xf32>
      %16 = arith.maximumf %14, %15 : vector<64x128xf32>
      %c0_16 = arith.constant 0 : index
      %c0_17 = arith.constant 0 : index
      %17 = vector.load %arg5[%c0_16, %c0_17] : memref<64x128xf32, #tpu.memory_space<vmem>>, vector<64x128xf32>
      tpu.vector_store %arg5[%c0_16, %c0_17], %16 {strides = array<i32>} : memref<64x128xf32, #tpu.memory_space<vmem>>, vector<64x128xf32>,
    } else {
    }
    return
  }
  func.func @transform_0(%arg0: i32, %arg1: i32) -> (i32, i32) {
    %c0_i32 = arith.constant 0 : i32
    return %arg0, %arg1 : i32, i32
  }
  func.func @transform_1(%arg0: i32, %arg1: i32) -> (i32, i32) {
    %c0_i32 = arith.constant 0 : i32
    %c0_i32_0 = arith.constant 0 : i32
    return %arg1, %c0_i32 : i32, i32
  }
  func.func @transform_2(%arg0: i32, %arg1: i32) -> (i32, i32) {
    %c0_i32 = arith.constant 0 : i32
    %c0_i32_0 = arith.constant 0 : i32
    %c0_i32_1 = arith.constant 0 : i32
    return %c0_i32, %c0_i32_0 : i32, i32
  }
  func.func @transform_3(%arg0: i32, %arg1: i32) -> (i32, i32) {
    %c0_i32 = arith.constant 0 : i32
    %c0_i32_0 = arith.constant 0 : i32
    return %arg0, %c0_i32 : i32, i32
  }
}

</mosaic_0001>

<bundles_post_ra>
// kernel: evolve_gcn_h_forward.3
= control target key start
LH: loop header
LB: loop body
LE: loop exit
PB: predicated region body
PF: predicated region fallthrough
CT: control target
= control target key end

     0   :  { %vm95_vm0 = vcmask 523264   ;;  %s605_s1 = inlined_call_operand.vmem [shape: bf16[64,128], index: 1, kind: input, shape index: {}]   ;;  %s606_s0 = inlined_call_operand.vmem [shape: bf16[64,64], index: 0, kind: input, shape index: {}]   ;;  %s607_s2 = inlined_call_operand.vmem [shape: f32[128,128], index: 2, kind: input, shape index: {}]   ;;  %s608_s3 = inlined_call_operand.vmem [shape: f32[64,128], index: 3, kind: output, shape index: {}]  }
   0x1   :  { %v477_v0 = vld [vmem:[%s605_s1] sm:$0xff]   ;;  %v478_v1 = vld [vmem:[%s605_s1 + $0x8] sm:$0xff]   ;;  %v479_v2 = vld [vmem:[%s605_s1 + $0x10] sm:$0xff]  }
   0x2   :  { %385 = vmatprep.subr.bf16.mxu0 %v477_v0  ;;  %v481_v3 = vld [vmem:[%s606_s0] sm:$0xff]   ;;  %v480_v4 = vld [vmem:[%s605_s1 + $0x18] sm:$0xff]   ;;  %v201_v6 = vld [vmem:[%s607_s2 + $0x8] sm:$0xff] }
   0x3   :  { %386 = vmatpush3.bf16.msra.mxu0 %v477_v0  ;;  %393 = vmatprep.mubr.msk.bf16.mxu0 %vm95_vm0, %v481_v3  ;;  %v200_v5 = vld [vmem:[%s607_s2] sm:$0xff]  ;;  %v202_v7 = vld [vmem:[%s607_s2 + $0x10] sm:$0xff]  ;;  %v203_v9 = vld [vmem:[%s607_s2 + $0x18] sm:$0xff] }
   0x4   :  { %387 = vmatprep.subr.bf16.mxu0 %v478_v1  ;;  %v445_v8 = vpack.c.bf16 %v201_v6, %v200_v5  ;;  %v449_v10 = vpack.c.bf16 %v203_v9, %v202_v7  ;;  %v204_v11 = vld [vmem:[%s607_s2 + $0x20] sm:$0xff]  ;;  %v205_v12 = vld [vmem:[%s607_s2 + $0x28] sm:$0xff]  ;;  %v206_v15 = vld [vmem:[%s607_s2 + $0x30] sm:$0xff] }
   0x5   :  { %v453_v13 = vpack.c.bf16 %v205_v12, %v204_v11  ;;  %v482_v14 = vld [vmem:[%s606_s0 + $0x8] sm:$0xff]   ;;  %v207_v16 = vld [vmem:[%s607_s2 + $0x38] sm:$0xff]  ;;  %v483_v17 = vld [vmem:[%s606_s0 + $0x10] sm:$0xff]  }
   0x6   :  { %446 = vmatprep.subr.bf16.mxu1 %v445_v8  ;;  %v457_v18 = vpack.c.bf16 %v207_v16, %v206_v15  ;;  %v208_v19 = vld [vmem:[%s607_s2 + $0x40] sm:$0xff]  ;;  %v209_v20 = vld [vmem:[%s607_s2 + $0x48] sm:$0xff]  ;;  %v484_v22 = vld [vmem:[%s606_s0 + $0x18] sm:$0xff]  }
   0x7   :  { %388 = vmatpush3.bf16.msra.mxu0 %v478_v1  ;;  %448 = vmatpush3.bf16.msra.mxu1 %v445_v8  ;;  %v461_v21 = vpack.c.bf16 %v209_v20, %v208_v19  ;;  %v210_v23 = vld [vmem:[%s607_s2 + $0x50] sm:$0xff]  ;;  %v211_v24 = vld [vmem:[%s607_s2 + $0x58] sm:$0xff]  ;;  %v212_v26 = vld [vmem:[%s607_s2 + $0x60] sm:$0xff] }
   0x8   :  { %389 = vmatprep.subr.bf16.mxu0 %v479_v2  ;;  %450 = vmatprep.subr.bf16.mxu1 %v449_v10  ;;  %v465_v25 = vpack.c.bf16 %v211_v24, %v210_v23  ;;  %v213_v27 = vld [vmem:[%s607_s2 + $0x68] sm:$0xff]  ;;  %v214_v29 = vld [vmem:[%s607_s2 + $0x70] sm:$0xff]  ;;  %v215_v30 = vld [vmem:[%s607_s2 + $0x78] sm:$0xff] }
   0x9   :  { %v469_v28 = vpack.c.bf16 %v213_v27, %v212_v26  ;;  %v473_v31 = vpack.c.bf16 %v215_v30, %v214_v29 }
   0xb   :  { %390 = vmatpush3.bf16.msra.mxu0 %v479_v2  ;;  %452 = vmatpush3.bf16.msra.mxu1 %v449_v10 }
   0xc   :  { %391 = vmatprep.subr.bf16.mxu0 %v480_v4  ;;  %454 = vmatprep.subr.bf16.mxu1 %v453_v13 }
   0xf   :  { %392 = vmatpush3.bf16.msra.mxu0 %v480_v4  ;;  %456 = vmatpush3.bf16.msra.mxu1 %v453_v13 }
  0x10   :  { %458 = vmatprep.subr.bf16.mxu1 %v457_v18 }
  0x12   :  { %394 = vmatmul.mubr.msk.bf16.vlgmr.msra.gmra.mrb[0].mxu0 %vm95_vm0, %v482_v14 }
  0x13   :  { %397 = vmatprep.mubr.msk.bf16.mxu0 %vm95_vm0, %v483_v17  ;;  %460 = vmatpush3.bf16.msra.mxu1 %v457_v18 }
  0x14   :  { %462 = vmatprep.subr.bf16.mxu1 %v461_v21 }
  0x17   :  { %464 = vmatpush3.bf16.msra.mxu1 %v461_v21 }
  0x18   :  { %466 = vmatprep.subr.bf16.mxu1 %v465_v25 }
  0x1a   :  { %398 = vmatmul.mubr.msk.bf16.gmra.mrb[4].mxu0 %vm95_vm0, %v484_v22 }
  0x1b   :  { %468 = vmatpush3.bf16.msra.mxu1 %v465_v25 }
  0x1c   :  { %470 = vmatprep.subr.bf16.mxu1 %v469_v28 }
  0x1f   :  { %472 = vmatpush3.bf16.msra.mxu1 %v469_v28 }
  0x20   :  { %474 = vmatprep.subr.bf16.mxu1 %v473_v31 }
  0x23   :  { %476 = vmatpush3.bf16.msra.mxu1 %v473_v31 }
  0xe5   :  { %v395_v32 = vpop.f32.mrb[0].mxu0 }
  0xe6   :  { %v142_v33 = vpop.f32.mrb[1].mxu0 }
  0xe7   :  { %v396_v34 = vpop.f32.mrb[2].mxu0  ;;  %433 = vmatprep.mubr.f32.mxu1 %v142_v33 }
  0xe8   :  { %v145_v35 = vpop.f32.mrb[3].mxu0 }
  0xe9   :  { %434 = vmatmul.mubr.f32.vlgmr.msra.gmra.mrb[0].mxu1 %v145_v35 }
  0xea   :  { %436 = vmatprep.mubr.f32.mxu1 %v395_v32 }
  0xed   :  { %v399_v36 = vpop.f32.mrb[4].mxu0  ;;  %437 = vmatmul.mubr.f32.gmra.mrb[2].mxu1 %v396_v34 }
  0xee   :  { %v158_v37 = vpop.f32.mrb[5].mxu0 }
  0xef   :  { %v400_v38 = vpop.f32.mrb[6].mxu0  ;;  %439 = vmatprep.mubr.f32.mxu1 %v158_v37 }
  0xf0   :  { %v161_v39 = vpop.f32.mrb[7].mxu0 }
  0xf1   :  { %440 = vmatmul.mubr.f32.gmra.mrb[4].mxu1 %v161_v39 }
  0xf2   :  { %442 = vmatprep.mubr.f32.mxu1 %v399_v36 }
  0xf5   :  { %443 = vmatmul.mubr.f32.gmra.mrb[6].mxu1 %v400_v38 }
 0x1bc   :  { %v435_v40 = vpop.f32.mrb[0].mxu1 }
 0x1bd   :  { %v322_v41 = vmax.f32 %v435_v40, 0.0  ;;  %v282_v42 = vpop.f32.mrb[1].mxu1 }
 0x1be   :  { %v321_v43 = vmax.f32 %v282_v42, 0.0 }
 0x1bf   :  { %330 = vst [vmem:[%s608_s3 + $0x8] sm:$0xff] %v322_v41 }
 0x1c0   :  { %329 = vst [vmem:[%s608_s3] sm:$0xff] %v321_v43  ;;  %v438_v44 = vpop.f32.mrb[2].mxu1 }
 0x1c1   :  { %v324_v45 = vmax.f32 %v438_v44, 0.0  ;;  %v292_v46 = vpop.f32.mrb[3].mxu1 }
 0x1c2   :  { %v323_v47 = vmax.f32 %v292_v46, 0.0 }
 0x1c3   :  { %332 = vst [vmem:[%s608_s3 + $0x18] sm:$0xff] %v324_v45 }
 0x1c4   :  { %331 = vst [vmem:[%s608_s3 + $0x10] sm:$0xff] %v323_v47  ;;  %v441_v48 = vpop.f32.mrb[4].mxu1 }
 0x1c5   :  { %v326_v49 = vmax.f32 %v441_v48, 0.0  ;;  %v302_v50 = vpop.f32.mrb[5].mxu1 }
 0x1c6   :  { %v325_v51 = vmax.f32 %v302_v50, 0.0 }
 0x1c7   :  { %334 = vst [vmem:[%s608_s3 + $0x28] sm:$0xff] %v326_v49 }
 0x1c8   :  { %333 = vst [vmem:[%s608_s3 + $0x20] sm:$0xff] %v325_v51  ;;  %v444_v52 = vpop.f32.mrb[6].mxu1 }
 0x1c9   :  { %v328_v53 = vmax.f32 %v444_v52, 0.0  ;;  %v312_v54 = vpop.f32.mrb[7].mxu1 }
 0x1ca   :  { %v327_v55 = vmax.f32 %v312_v54, 0.0 }
 0x1cb   :  { %336 = vst [vmem:[%s608_s3 + $0x38] sm:$0xff] %v328_v53 }
 0x1cc   :  { %335 = vst [vmem:[%s608_s3 + $0x30] sm:$0xff] %v327_v55 }

// kernel: evolve_gcn_h_forward.2
= control target key start
LH: loop header
LB: loop body
LE: loop exit
PB: predicated region body
PF: predicated region fallthrough
CT: control target
= control target key end

     0   :  { %vm52_vm0 = vcmask 261120   ;;  %s2693_s4 = inlined_call_operand.vmem [shape: f32[3,32,32], index: 4, kind: input, shape index: {}]   ;;  %s2694_s3 = inlined_call_operand.vmem [shape: f32[32,32], index: 3, kind: input, shape index: {}]   ;;  %s2695_s5 = inlined_call_operand.vmem [shape: f32[3,1,32], index: 5, kind: input, shape index: {}]   ;;  %s2696_s0 = inlined_call_operand.vmem [shape: f32[4,1,32], index: 0, kind: input, shape index: {}]   ;;  %s2697_s1 = inlined_call_operand.vmem [shape: f32[4,1,32], index: 1, kind: input, shape index: {}]   ;;  %s2698_s2 = inlined_call_operand.vmem [shape: f32[4,1,32], index: 2, kind: input, shape index: {}]   ;;  %s2699_s6 = inlined_call_operand.vmem [shape: f32[4,32,32], index: 6, kind: output, shape index: {}]  }
   0x1   :  { %v23_v0 = vld [vmem:[%s2693_s4] sm:$0xff]  ;;  %v24_v1 = vld [vmem:[%s2693_s4 + $0x8] sm:$0xff]  ;;  %v25_v2 = vld [vmem:[%s2693_s4 + $0x10] sm:$0xff] }
   0x2   :  { %v2275_v3 = vpack.c.bf16 %v24_v1, %v23_v0  ;;  %v26_v4 = vld [vmem:[%s2693_s4 + $0x18] sm:$0xff]  ;;  %v2283_v5 = vld [vmem:[%s2694_s3] sm:$0xff]  ;;  %v1586_v8 = vld [vmem:[%s2693_s4 + $0x28] sm:$0xff] }
   0x3   :  { %v2285_v6 = vpack.c.bf16 %v26_v4, %v25_v2  ;;  %1815 = vmatprep.mubr.msk.f32.mxu0 %vm52_vm0, %v2283_v5  ;;  %v1585_v7 = vld [vmem:[%s2693_s4 + $0x20] sm:$0xff]  ;;  %1829 = vmatprep.mubr.msk.f32.mxu1 %vm52_vm0, %v2283_v5  ;;  %v1587_v9 = vld [vmem:[%s2693_s4 + $0x30] sm:$0xff]  ;;  %v1588_v10 = vld [vmem:[%s2693_s4 + $0x38] sm:$0xff] }
   0x4   :  { %1976 = vmatprep.subr.bf16.mxu0 %v2275_v3  ;;  %v2305_v11 = vpack.c.bf16 %v1586_v8, %v1585_v7  ;;  %v2307_v12 = vpack.c.bf16 %v1588_v10, %v1587_v9  ;;  %v1589_v13 = vld [vmem:[%s2693_s4 + $0x40] sm:$0xff]  ;;  %v1590_v14 = vld [vmem:[%s2693_s4 + $0x48] sm:$0xff]  ;;  %v1591_v16 = vld [vmem:[%s2693_s4 + $0x50] sm:$0xff] }
   0x5   :  { %1978 = vmatpush3.bf16.msra.mxu0 %v2275_v3  ;;  %v2316_v15 = vpack.c.bf16 %v1590_v14, %v1589_v13  ;;  %v1592_v17 = vld [vmem:[%s2693_s4 + $0x58] sm:$0xff]  ;;  %v2330_v18 = vld [vmem:[%s2694_s3 + $0x8] sm:$0xff]  ;;  %v2336_v19 = vld [vmem:[%s2694_s3 + $0x10] sm:$0xff] }
   0x6   :  { %1980 = vmatprep.subr.bf16.mxu0 %v2285_v6  ;;  %1984 = vmatprep.subr.bf16.mxu1 %v2305_v11  ;;  %v2339_v20 = vpack.c.bf16 %v1592_v17, %v1591_v16  ;;  %v2349_v21 = vld [vmem:[%s2694_s3 + $0x18] sm:$0xff]  ;;  %v2383_v22 = vld [vmem:[%s2695_s5] ss:$0 sm:$0xff]  ;;  %v2392_v27 = vld [vmem:[%s2695_s5 + $0x1] ss:$0 sm:$0xff] }
   0x7   :  { %1986 = vmatpush3.bf16.msra.mxu1 %v2305_v11  ;;  %v1610_v24 = vld [vmem:[%s2696_s0] ss:$0 sm:$0xff]  ;;  %v2407_v13 = vld [vmem:[%s2695_s5 + $0x2] ss:$0 sm:$0xff] }
   0x8   :  { %1988 = vmatprep.subr.bf16.mxu1 %v2307_v12  ;;  %v1615_v31 = vld [vmem:[%s2697_s1] ss:$0 sm:$0xff] }
   0x9   :  { %1982 = vmatpush3.bf16.msra.mxu0 %v2285_v6 }
   0xa   :  { %1992 = vmatprep.subr.bf16.mxu0 %v2316_v15 }
   0xb   :  { %1990 = vmatpush3.bf16.msra.mxu1 %v2307_v12 }
   0xc   :  { %1816 = vmatmul.mubr.msk.f32.vlgmr.msra.gmra.mrb[0].mxu0 %vm52_vm0, %v2330_v18  ;;  %2000 = vmatprep.subr.bf16.mxu1 %v2275_v3 }
   0xd   :  { %1818 = vmatprep.mubr.msk.f32.mxu0 %vm52_vm0, %v2336_v19  ;;  %1994 = vmatpush3.bf16.msra.mxu0 %v2316_v15 }
   0xe   :  { %1996 = vmatprep.subr.bf16.mxu0 %v2339_v20  ;;  %1830 = vmatmul.mubr.msk.f32.vlgmr.msra.gmra.mrb[0].mxu1 %vm52_vm0, %v2330_v18 }
   0xf   :  { %1832 = vmatprep.mubr.msk.f32.mxu1 %vm52_vm0, %v2336_v19  ;;  %2002 = vmatpush3.bf16.msra.mxu1 %v2275_v3 }
  0x10   :  { %1819 = vmatmul.mubr.msk.f32.gmra.mrb[2].mxu0 %vm52_vm0, %v2349_v21  ;;  %2004 = vmatprep.subr.bf16.mxu1 %v2285_v6 }
  0x11   :  { %1998 = vmatpush3.bf16.msra.mxu0 %v2339_v20  ;;  %1843 = vmatprep.mubr.msk.f32.mxu0 %vm52_vm0, %v2283_v5 }
  0x12   :  { %2008 = vmatprep.subr.bf16.mxu0 %v2305_v11  ;;  %1833 = vmatmul.mubr.msk.f32.gmra.mrb[2].mxu1 %vm52_vm0, %v2349_v21 }
  0x13   :  { %2006 = vmatpush3.bf16.msra.mxu1 %v2285_v6 }
  0x14   :  { %1844 = vmatmul.mubr.msk.f32.vlgmr.msra.gmra.mrb[4].mxu0 %vm52_vm0, %v2330_v18  ;;  %2016 = vmatprep.subr.bf16.mxu1 %v2316_v15 }
  0x15   :  { %1846 = vmatprep.mubr.msk.f32.mxu0 %vm52_vm0, %v2336_v19  ;;  %2010 = vmatpush3.bf16.msra.mxu0 %v2305_v11 }
  0x16   :  { %2012 = vmatprep.subr.bf16.mxu0 %v2307_v12 }
  0x18   :  { %1847 = vmatmul.mubr.msk.f32.gmra.mrb[6].mxu0 %vm52_vm0, %v2349_v21 }
  0x19   :  { %2014 = vmatpush3.bf16.msra.mxu0 %v2307_v12 }
  0x1a   :  { %2024 = vmatprep.subr.bf16.mxu0 %v2275_v3 }
  0xdf   :  { %v1817_v23 = vpop.f32.mrb[0].mxu0 }
  0xe0   :  { %v137_v25 = vadd.f32 %v1817_v23, %v2383_v22  ;;  %v131_v26 = vpop.f32.mrb[1].mxu0 }
  0xe1   :  { %v132_v28 = vadd.f32 %v2383_v22, %v131_v26  ;;  %v1831_v30 = vpop.f32.mrb[0].mxu1 }
  0xe2   :  { %v340_v29 = vadd.f32 %v1610_v24, %v137_v25  ;;  %v228_v34 = vadd.f32 %v1831_v30, %v2392_v27  ;;  %v222_v35 = vpop.f32.mrb[1].mxu1  ;;  %v1620_v30 = vld [vmem:[%s2698_s2] ss:$0 sm:$0xff] }
  0xe3   :  { %v339_v32 = vadd.f32 %v1610_v24, %v132_v28  ;;  %v1820_v33 = vpop.f32.mrb[2].mxu0  ;;  %v223_v39 = vadd.f32 %v2392_v27, %v222_v35 }
  0xe4   :  { %v1612_v36 = vmul.f32 -1.442695, %v340_v29  ;;  %v147_v37 = vadd.f32 %v1820_v33, %v2383_v22  ;;  %v141_v38 = vpop.f32.mrb[3].mxu0  ;;  %v375_v42 = vadd.f32 %v1615_v31, %v228_v34 }
  0xe5   :  { %v1611_v40 = vmul.f32 -1.442695, %v339_v32  ;;  %v142_v41 = vadd.f32 %v2383_v22, %v141_v38  ;;  %v374_v44 = vadd.f32 %v1615_v31, %v223_v39  ;;  %v1834_v45 = vpop.f32.mrb[2].mxu1 }
  0xe6   :  { %2071 = vpow2.f32 %v1612_v36  ;;  %v342_v43 = vadd.f32 %v1610_v24, %v147_v37  ;;  %v1617_v47 = vmul.f32 -1.442695, %v375_v42  ;;  %v238_v48 = vadd.f32 %v1834_v45, %v2392_v27  ;;  %v232_v49 = vpop.f32.mrb[3].mxu1 }
  0xe7   :  { %2073 = vpow2.f32 %v1611_v40  ;;  %v341_v46 = vadd.f32 %v1610_v24, %v142_v41  ;;  %v1845_v50 = vpop.f32.mrb[4].mxu0  ;;  %v1616_v52 = vmul.f32 -1.442695, %v374_v44  ;;  %v233_v53 = vadd.f32 %v2392_v27, %v232_v49 }
  0xe8   :  { %v1614_v51 = vmul.f32 -1.442695, %v342_v43  ;;  %v313_v54 = vpop.f32.mrb[5].mxu0  ;;  %2075 = vpow2.f32 %v1617_v47  ;;  %v377_v56 = vadd.f32 %v1615_v31, %v238_v48  ;;  %v319_v24 = vadd.f32 %v1845_v50, %v2407_v13 }
  0xe9   :  { %v1613_v55 = vmul.f32 -1.442695, %v341_v46  ;;  %v376_v57 = vadd.f32 %v1615_v31, %v233_v53  ;;  %v314_v25 = vadd.f32 %v2407_v13, %v313_v54 }
  0xea   :  { %2077 = vpow2.f32 %v1614_v51  ;;  %v1619_v58 = vmul.f32 -1.442695, %v377_v56 }
  0xeb   :  { %2079 = vpow2.f32 %v1613_v55  ;;  %v1848_v59 = vpop.f32.mrb[6].mxu0  ;;  %v1618_v60 = vmul.f32 -1.442695, %v376_v57 }
  0xec   :  { %2081 = vpow2.f32 %v1616_v52  ;;  %v323_v61 = vpop.f32.mrb[7].mxu0  ;;  %v329_v33 = vadd.f32 %v1848_v59, %v2407_v13 }
  0xed   :  { %2083 = vpow2.f32 %v1619_v58  ;;  %v324_v35 = vadd.f32 %v2407_v13, %v323_v61 }
  0xee   :  { %2085 = vpow2.f32 %v1618_v60 }
  0xf0   :  { %v2072_v62 = vpop.eup %2071 }
  0xf1   :  { %v2074_v63 = vpop.eup %2073  ;;  %v356_v0 = vadd.f32 1.0, %v2072_v62 }
  0xf2   :  { %v355_v1 = vadd.f32 1.0, %v2074_v63  ;;  %v2076_v2 = vpop.eup %2075 }
  0xf3   :  { %2087 = vrcp.f32 %v356_v0  ;;  %v391_v14 = vadd.f32 1.0, %v2076_v2 }
  0xf4   :  { %v2078_v4 = vpop.eup %2077  ;;  %2089 = vrcp.f32 %v355_v1  ;;  %v1634_v1 = vld [vmem:[%s2696_s0 + $0x1] ss:$0 sm:$0xff] }
  0xf5   :  { %v2080_v7 = vpop.eup %2079  ;;  %v358_v8 = vadd.f32 1.0, %v2078_v4 }
  0xf6   :  { %v2082_v9 = vpop.eup %2081  ;;  %v357_v10 = vadd.f32 1.0, %v2080_v7 }
  0xf7   :  { %2091 = vrcp.f32 %v358_v8  ;;  %v2084_v16 = vpop.eup %2083  ;;  %v390_v17 = vadd.f32 1.0, %v2082_v9 }
  0xf8   :  { %2093 = vrcp.f32 %v357_v10  ;;  %v2086_v23 = vpop.eup %2085  ;;  %v393_v26 = vadd.f32 1.0, %v2084_v16  ;;  %v1640_v16 = vld [vmem:[%s2697_s1 + $0x1] ss:$0 sm:$0xff] }
  0xf9   :  { %2095 = vrcp.f32 %v391_v14  ;;  %v392_v29 = vadd.f32 1.0, %v2086_v23 }
  0xfa   :  { %2097 = vrcp.f32 %v390_v17 }
  0xfb   :  { %2099 = vrcp.f32 %v393_v26 }
  0xfc   :  { %2101 = vrcp.f32 %v392_v29 }
  0xfd   :  { %v2088_v28 = vpop.eup %2087 }
  0xfe   :  { %v2090_v31 = vpop.eup %2089  ;;  %v404_v32 = vmul.f32 %v2088_v28, %v319_v24 }
  0xff   :  { %v403_v34 = vmul.f32 %v2090_v31, %v314_v25 }
 0x100   :  { %v414_v36 = vadd.f32 %v1620_v30, %v404_v32 }
 0x101   :  { %v2092_v37 = vpop.eup %2091  ;;  %v413_v38 = vadd.f32 %v1620_v30, %v403_v34 }
 0x102   :  { %v2094_v39 = vpop.eup %2093  ;;  %2103 = vtanh.f32 %v414_v36  ;;  %v406_v40 = vmul.f32 %v2092_v37, %v329_v33 }
 0x103   :  { %2105 = vtanh.f32 %v413_v38  ;;  %v405_v41 = vmul.f32 %v2094_v39, %v324_v35  ;;  %v2096_v44 = vpop.eup %2095 }
 0x104   :  { %v416_v42 = vadd.f32 %v1620_v30, %v406_v40  ;;  %v2098_v45 = vpop.eup %2097  ;;  %v422_v46 = vsub.f32 1.0, %v2096_v44  ;;  %v430_v52 = vmul.f32 %v2096_v44, %v2330_v18 }
 0x105   :  { %v415_v43 = vadd.f32 %v1620_v30, %v405_v41  ;;  %v2100_v47 = vpop.eup %2099  ;;  %v421_v48 = vsub.f32 1.0, %v2098_v45  ;;  %v429_v56 = vmul.f32 %v2098_v45, %v2283_v5 }
 0x106   :  { %2107 = vtanh.f32 %v416_v42  ;;  %v2102_v49 = vpop.eup %2101  ;;  %v424_v54 = vsub.f32 1.0, %v2100_v47  ;;  %v432_v18 = vmul.f32 %v2100_v47, %v2349_v21 }
 0x107   :  { %2109 = vtanh.f32 %v415_v43  ;;  %v423_v57 = vsub.f32 1.0, %v2102_v49  ;;  %v431_v63 = vmul.f32 %v2102_v49, %v2336_v19 }
 0x10c   :  { %v2104_v50 = vpop.eup %2103 }
 0x10d   :  { %v2106_v51 = vpop.eup %2105  ;;  %v426_v53 = vmul.f32 %v2104_v50, %v422_v46 }
 0x10e   :  { %v425_v55 = vmul.f32 %v2106_v51, %v421_v48 }
 0x10f   :  { %v2418_v58 = vadd.f32 %v430_v52, %v426_v53 }
 0x110   :  { %v2108_v59 = vpop.eup %2107  ;;  %v2420_v60 = vadd.f32 %v429_v56, %v425_v55 }
 0x111   :  { %v2110_v61 = vpop.eup %2109  ;;  %438 = vst.msk [vmem:[%s2699_s6 + $0x8] sm:$0xff] %vm52_vm0, %v2418_v58  ;;  %v428_v62 = vmul.f32 %v2108_v59, %v424_v54 }
 0x112   :  { %437 = vst.msk [vmem:[%s2699_s6] sm:$0xff] %vm52_vm0, %v2420_v60  ;;  %1857 = vmatprep.mubr.msk.f32.mxu1 %vm52_vm0, %v2420_v60  ;;  %1871 = vmatprep.mubr.msk.f32.mxu0 %vm52_vm0, %v2420_v60  ;;  %v427_v5 = vmul.f32 %v2110_v61, %v423_v57 }
 0x113   :  { %1858 = vmatmul.mubr.msk.f32.vlgmr.msra.gmra.mrb[4].mxu1 %vm52_vm0, %v2418_v58  ;;  %1872 = vmatmul.mubr.msk.f32.vlgmr.msra.gmra.mrb[8].mxu0 %vm52_vm0, %v2418_v58  ;;  %v2442_v21 = vadd.f32 %v432_v18, %v428_v62 }
 0x114   :  { %2018 = vmatpush3.bf16.msra.mxu1 %v2316_v15  ;;  %v2445_v0 = vadd.f32 %v431_v63, %v427_v5  ;;  %2026 = vmatpush3.bf16.msra.mxu0 %v2275_v3 }
 0x115   :  { %440 = vst.msk [vmem:[%s2699_s6 + $0x18] sm:$0xff] %vm52_vm0, %v2442_v21  ;;  %2020 = vmatprep.subr.bf16.mxu1 %v2339_v20  ;;  %2028 = vmatprep.subr.bf16.mxu0 %v2285_v6 }
 0x116   :  { %439 = vst.msk [vmem:[%s2699_s6 + $0x10] sm:$0xff] %vm52_vm0, %v2445_v0  ;;  %1860 = vmatprep.mubr.msk.f32.mxu1 %vm52_vm0, %v2445_v0  ;;  %1874 = vmatprep.mubr.msk.f32.mxu0 %vm52_vm0, %v2445_v0 }
 0x117   :  { %1861 = vmatmul.mubr.msk.f32.gmra.mrb[6].mxu1 %vm52_vm0, %v2442_v21  ;;  %1875 = vmatmul.mubr.msk.f32.gmra.mrb[10].mxu0 %vm52_vm0, %v2442_v21 }
 0x118   :  { %2022 = vmatpush3.bf16.msra.mxu1 %v2339_v20  ;;  %1885 = vmatprep.mubr.msk.f32.mxu1 %vm52_vm0, %v2420_v60 }
 0x119   :  { %2032 = vmatprep.subr.bf16.mxu1 %v2305_v11  ;;  %2030 = vmatpush3.bf16.msra.mxu0 %v2285_v6 }
 0x11a   :  { %2040 = vmatprep.subr.bf16.mxu0 %v2316_v15 }
 0x11b   :  { %1886 = vmatmul.mubr.msk.f32.vlgmr.msra.gmra.mrb[8].mxu1 %vm52_vm0, %v2418_v58 }
 0x11c   :  { %1888 = vmatprep.mubr.msk.f32.mxu1 %vm52_vm0, %v2445_v0  ;;  %2034 = vmatpush3.bf16.msra.mxu1 %v2305_v11 }
 0x11d   :  { %2036 = vmatprep.subr.bf16.mxu1 %v2307_v12 }
 0x11f   :  { %1889 = vmatmul.mubr.msk.f32.gmra.mrb[10].mxu1 %vm52_vm0, %v2442_v21 }
 0x120   :  { %2038 = vmatpush3.bf16.msra.mxu1 %v2307_v12 }
 0x121   :  { %2048 = vmatprep.subr.bf16.mxu1 %v2275_v3 }
 0x1e6   :  { %v1859_v19 = vpop.f32.mrb[4].mxu1  ;;  %v1873_v2 = vpop.f32.mrb[8].mxu0 }
 0x1e7   :  { %v525_v4 = vadd.f32 %v1859_v19, %v2383_v22  ;;  %v519_v7 = vpop.f32.mrb[5].mxu1  ;;  %v604_v8 = vpop.f32.mrb[9].mxu0  ;;  %v610_v9 = vadd.f32 %v1873_v2, %v2392_v27 }
 0x1e8   :  { %v520_v10 = vadd.f32 %v2383_v22, %v519_v7  ;;  %v605_v23 = vadd.f32 %v2392_v27, %v604_v8  ;;  %v1646_v7 = vld [vmem:[%s2698_s2 + $0x1] ss:$0 sm:$0xff] }
 0x1e9   :  { %v717_v14 = vadd.f32 %v1634_v1, %v525_v4  ;;  %v753_v32 = vadd.f32 %v1640_v16, %v610_v9 }
 0x1ea   :  { %v716_v17 = vadd.f32 %v1634_v1, %v520_v10  ;;  %v1862_v24 = vpop.f32.mrb[6].mxu1  ;;  %v1876_v25 = vpop.f32.mrb[10].mxu0  ;;  %v752_v37 = vadd.f32 %v1640_v16, %v605_v23 }
 0x1eb   :  { %v1636_v26 = vmul.f32 -1.442695, %v717_v14  ;;  %v535_v28 = vadd.f32 %v1862_v24, %v2383_v22  ;;  %v620_v29 = vadd.f32 %v1876_v25, %v2392_v27  ;;  %v529_v30 = vpop.f32.mrb[7].mxu1  ;;  %v614_v31 = vpop.f32.mrb[11].mxu0  ;;  %v1642_v43 = vmul.f32 -1.442695, %v753_v32 }
 0x1ec   :  { %v1635_v33 = vmul.f32 -1.442695, %v716_v17  ;;  %v530_v34 = vadd.f32 %v2383_v22, %v529_v30  ;;  %v615_v36 = vadd.f32 %v2392_v27, %v614_v31  ;;  %v1641_v46 = vmul.f32 -1.442695, %v752_v37 }
 0x1ed   :  { %2111 = vpow2.f32 %v1636_v26  ;;  %v719_v35 = vadd.f32 %v1634_v1, %v535_v28  ;;  %v755_v41 = vadd.f32 %v1640_v16, %v620_v29 }
 0x1ee   :  { %v718_v38 = vadd.f32 %v1634_v1, %v530_v34  ;;  %v1887_v39 = vpop.f32.mrb[8].mxu1  ;;  %2113 = vpow2.f32 %v1635_v33  ;;  %v754_v45 = vadd.f32 %v1640_v16, %v615_v36 }
 0x1ef   :  { %v1638_v40 = vmul.f32 -1.442695, %v719_v35  ;;  %v689_v42 = vpop.f32.mrb[9].mxu1  ;;  %v1644_v48 = vmul.f32 -1.442695, %v755_v41  ;;  %v695_v1 = vadd.f32 %v1887_v39, %v2407_v13 }
 0x1f0   :  { %v1637_v44 = vmul.f32 -1.442695, %v718_v38  ;;  %v1643_v50 = vmul.f32 -1.442695, %v754_v45  ;;  %v690_v9 = vadd.f32 %v2407_v13, %v689_v42 }
 0x1f1   :  { %2115 = vpow2.f32 %v1638_v40 }
 0x1f2   :  { %v1890_v47 = vpop.f32.mrb[10].mxu1  ;;  %2117 = vpow2.f32 %v1637_v44 }
 0x1f3   :  { %v699_v49 = vpop.f32.mrb[11].mxu1  ;;  %2119 = vpow2.f32 %v1642_v43  ;;  %v705_v23 = vadd.f32 %v1890_v47, %v2407_v13 }
 0x1f4   :  { %2121 = vpow2.f32 %v1641_v46  ;;  %v700_v28 = vadd.f32 %v2407_v13, %v699_v49 }
 0x1f5   :  { %2123 = vpow2.f32 %v1644_v48 }
 0x1f6   :  { %2125 = vpow2.f32 %v1643_v50 }
 0x1f7   :  { %v2112_v51 = vpop.eup %2111 }
 0x1f8   :  { %v733_v52 = vadd.f32 1.0, %v2112_v51  ;;  %v2114_v53 = vpop.eup %2113 }
 0x1f9   :  { %v732_v54 = vadd.f32 1.0, %v2114_v53 }
 0x1fa   :  { %2127 = vrcp.f32 %v733_v52 }
 0x1fb   :  { %v2116_v55 = vpop.eup %2115  ;;  %2129 = vrcp.f32 %v732_v54 }
 0x1fc   :  { %v735_v56 = vadd.f32 1.0, %v2116_v55  ;;  %v2118_v57 = vpop.eup %2117 }
 0x1fd   :  { %v2120_v59 = vpop.eup %2119  ;;  %v734_v61 = vadd.f32 1.0, %v2118_v57 }
 0x1fe   :  { %2131 = vrcp.f32 %v735_v56  ;;  %v2122_v62 = vpop.eup %2121  ;;  %v769_v5 = vadd.f32 1.0, %v2120_v59 }
 0x1ff   :  { %2133 = vrcp.f32 %v734_v61  ;;  %v2124_v18 = vpop.eup %2123  ;;  %v768_v19 = vadd.f32 1.0, %v2122_v62  ;;  %v1670_v61 = vld [vmem:[%s2697_s1 + $0x2] ss:$0 sm:$0xff] }
 0x200   :  { %v2126_v63 = vpop.eup %2125  ;;  %v771_v4 = vadd.f32 1.0, %v2124_v18  ;;  %2135 = vrcp.f32 %v769_v5 }
 0x201   :  { %v770_v14 = vadd.f32 1.0, %v2126_v63  ;;  %2137 = vrcp.f32 %v768_v19 }
 0x202   :  { %2139 = vrcp.f32 %v771_v4 }
 0x204   :  { %v2128_v2 = vpop.eup %2127 }
 0x205   :  { %v783_v8 = vmul.f32 %v2128_v2, %v695_v1  ;;  %v2130_v10 = vpop.eup %2129 }
 0x206   :  { %v782_v17 = vmul.f32 %v2130_v10, %v690_v9 }
 0x207   :  { %v793_v16 = vadd.f32 %v1646_v7, %v783_v8 }
 0x208   :  { %v2132_v24 = vpop.eup %2131  ;;  %v792_v25 = vadd.f32 %v1646_v7, %v782_v17 }
 0x209   :  { %2141 = vtanh.f32 %v793_v16  ;;  %v785_v26 = vmul.f32 %v2132_v24, %v705_v23  ;;  %v2134_v29 = vpop.eup %2133 }
 0x20a   :  { %2143 = vrcp.f32 %v770_v14  ;;  %v784_v31 = vmul.f32 %v2134_v29, %v700_v28  ;;  %v2136_v33 = vpop.eup %2135 }
 0x20b   :  { %2145 = vtanh.f32 %v792_v25  ;;  %v795_v30 = vadd.f32 %v1646_v7, %v785_v26  ;;  %v2138_v34 = vpop.eup %2137  ;;  %v801_v36 = vsub.f32 1.0, %v2136_v33  ;;  %v809_v39 = vmul.f32 %v2136_v33, %v2418_v58 }
 0x20c   :  { %v794_v32 = vadd.f32 %v1646_v7, %v784_v31  ;;  %v2140_v35 = vpop.eup %2139  ;;  %v800_v41 = vsub.f32 1.0, %v2138_v34  ;;  %v808_v44 = vmul.f32 %v2138_v34, %v2420_v60 }
 0x20d   :  { %2147 = vtanh.f32 %v795_v30  ;;  %v803_v46 = vsub.f32 1.0, %v2140_v35  ;;  %v811_v50 = vmul.f32 %v2140_v35, %v2442_v21 }
 0x20e   :  { %2149 = vtanh.f32 %v794_v32 }
 0x213   :  { %v2142_v37 = vpop.eup %2141 }
 0x214   :  { %v2144_v38 = vpop.eup %2143  ;;  %v805_v40 = vmul.f32 %v2142_v37, %v801_v36 }
 0x215   :  { %v2146_v42 = vpop.eup %2145  ;;  %v802_v49 = vsub.f32 1.0, %v2144_v38  ;;  %v810_v52 = vmul.f32 %v2144_v38, %v2445_v0 }
 0x216   :  { %v804_v43 = vmul.f32 %v2146_v42, %v800_v41  ;;  %v2507_v45 = vadd.f32 %v809_v39, %v805_v40 }
 0x217   :  { %v2148_v47 = vpop.eup %2147 }
 0x218   :  { %v2509_v48 = vadd.f32 %v808_v44, %v804_v43  ;;  %1648 = vst.msk [vmem:[%s2699_s6 + $0x28] sm:$0xff] %vm52_vm0, %v2507_v45  ;;  %v807_v58 = vmul.f32 %v2148_v47, %v803_v46  ;;  %v2150_v51 = vpop.eup %2149 }
 0x219   :  { %v806_v60 = vmul.f32 %v2150_v51, %v802_v49 }
 0x21a   :  { %1647 = vst.msk [vmem:[%s2699_s6 + $0x20] sm:$0xff] %vm52_vm0, %v2509_v48  ;;  %1899 = vmatprep.mubr.msk.f32.mxu0 %vm52_vm0, %v2509_v48  ;;  %1913 = vmatprep.mubr.msk.f32.mxu1 %vm52_vm0, %v2509_v48  ;;  %v2527_v53 = vadd.f32 %v811_v50, %v807_v58 }
 0x21b   :  { %1900 = vmatmul.mubr.msk.f32.vlgmr.msra.gmra.mrb[12].mxu0 %vm52_vm0, %v2507_v45  ;;  %1914 = vmatmul.mubr.msk.f32.vlgmr.msra.gmra.mrb[12].mxu1 %vm52_vm0, %v2507_v45  ;;  %v2534_v21 = vadd.f32 %v810_v52, %v806_v60 }
 0x21c   :  { %2042 = vmatpush3.bf16.msra.mxu0 %v2316_v15  ;;  %1650 = vst.msk [vmem:[%s2699_s6 + $0x38] sm:$0xff] %vm52_vm0, %v2527_v53  ;;  %2050 = vmatpush3.bf16.msra.mxu1 %v2275_v3 }
 0x21d   :  { %2044 = vmatprep.subr.bf16.mxu0 %v2339_v20  ;;  %2052 = vmatprep.subr.bf16.mxu1 %v2285_v6  ;;  %1649 = vst.msk [vmem:[%s2699_s6 + $0x30] sm:$0xff] %vm52_vm0, %v2534_v21 }
 0x21e   :  { %1902 = vmatprep.mubr.msk.f32.mxu0 %vm52_vm0, %v2534_v21  ;;  %1916 = vmatprep.mubr.msk.f32.mxu1 %vm52_vm0, %v2534_v21 }
 0x21f   :  { %1903 = vmatmul.mubr.msk.f32.gmra.mrb[14].mxu0 %vm52_vm0, %v2527_v53  ;;  %1917 = vmatmul.mubr.msk.f32.gmra.mrb[14].mxu1 %vm52_vm0, %v2527_v53 }
 0x220   :  { %2046 = vmatpush3.bf16.msra.mxu0 %v2339_v20  ;;  %1927 = vmatprep.mubr.msk.f32.mxu0 %vm52_vm0, %v2509_v48 }
 0x221   :  { %2056 = vmatprep.subr.bf16.mxu0 %v2305_v11  ;;  %2054 = vmatpush3.bf16.msra.mxu1 %v2285_v6  ;;  %v1664_v6 = vld [vmem:[%s2696_s0 + $0x2] ss:$0 sm:$0xff] }
 0x222   :  { %2064 = vmatprep.subr.bf16.mxu1 %v2316_v15 }
 0x223   :  { %1928 = vmatmul.mubr.msk.f32.vlgmr.msra.gmra.mrb[16].mxu0 %vm52_vm0, %v2507_v45 }
 0x224   :  { %1930 = vmatprep.mubr.msk.f32.mxu0 %vm52_vm0, %v2534_v21  ;;  %2058 = vmatpush3.bf16.msra.mxu0 %v2305_v11 }
 0x225   :  { %2060 = vmatprep.subr.bf16.mxu0 %v2307_v12 }
 0x227   :  { %1931 = vmatmul.mubr.msk.f32.gmra.mrb[18].mxu0 %vm52_vm0, %v2527_v53 }
 0x228   :  { %2062 = vmatpush3.bf16.msra.mxu0 %v2307_v12 }
 0x2ee   :  { %v1901_v3 = vpop.f32.mrb[12].mxu0  ;;  %v1915_v0 = vpop.f32.mrb[12].mxu1 }
 0x2ef   :  { %v905_v54 = vadd.f32 %v1901_v3, %v2383_v22  ;;  %v899_v55 = vpop.f32.mrb[13].mxu0  ;;  %v984_v56 = vpop.f32.mrb[13].mxu1  ;;  %v990_v57 = vadd.f32 %v1915_v0, %v2392_v27  ;;  %v1676_v3 = vld [vmem:[%s2698_s2 + $0x2] ss:$0 sm:$0xff] }
 0x2f0   :  { %v900_v11 = vadd.f32 %v2383_v22, %v899_v55  ;;  %v985_v62 = vadd.f32 %v2392_v27, %v984_v56 }
 0x2f1   :  { %v1097_v59 = vadd.f32 %v1664_v6, %v905_v54  ;;  %v1133_v7 = vadd.f32 %v1670_v61, %v990_v57 }
 0x2f2   :  { %v1096_v12 = vadd.f32 %v1664_v6, %v900_v11  ;;  %v1904_v18 = vpop.f32.mrb[14].mxu0  ;;  %v1918_v5 = vpop.f32.mrb[14].mxu1  ;;  %v1132_v16 = vadd.f32 %v1670_v61, %v985_v62 }
 0x2f3   :  { %v1666_v63 = vmul.f32 -1.442695, %v1097_v59  ;;  %v915_v19 = vadd.f32 %v1904_v18, %v2383_v22  ;;  %v1000_v1 = vadd.f32 %v1918_v5, %v2392_v27  ;;  %v909_v2 = vpop.f32.mrb[15].mxu0  ;;  %v994_v4 = vpop.f32.mrb[15].mxu1  ;;  %v1672_v28 = vmul.f32 -1.442695, %v1133_v7 }
 0x2f4   :  { %v1665_v8 = vmul.f32 -1.442695, %v1096_v12  ;;  %v910_v9 = vadd.f32 %v2383_v22, %v909_v2  ;;  %v995_v14 = vadd.f32 %v2392_v27, %v994_v4  ;;  %v1671_v31 = vmul.f32 -1.442695, %v1132_v16 }
 0x2f5   :  { %2151 = vpow2.f32 %v1666_v63  ;;  %v1099_v10 = vadd.f32 %v1664_v6, %v915_v19  ;;  %v1135_v25 = vadd.f32 %v1670_v61, %v1000_v1 }
 0x2f6   :  { %v1098_v17 = vadd.f32 %v1664_v6, %v910_v9  ;;  %v1929_v23 = vpop.f32.mrb[16].mxu0  ;;  %2153 = vpow2.f32 %v1665_v8  ;;  %v1134_v30 = vadd.f32 %v1670_v61, %v995_v14 }
 0x2f7   :  { %v1668_v24 = vmul.f32 -1.442695, %v1099_v10  ;;  %v1069_v26 = vpop.f32.mrb[17].mxu0  ;;  %v1674_v33 = vmul.f32 -1.442695, %v1135_v25  ;;  %v1075_v51 = vadd.f32 %v1929_v23, %v2407_v13 }
 0x2f8   :  { %v1667_v29 = vmul.f32 -1.442695, %v1098_v17  ;;  %v1673_v35 = vmul.f32 -1.442695, %v1134_v30  ;;  %v1070_v0 = vadd.f32 %v2407_v13, %v1069_v26 }
 0x2f9   :  { %2155 = vpow2.f32 %v1668_v24 }
 0x2fa   :  { %v1932_v32 = vpop.f32.mrb[18].mxu0  ;;  %2157 = vpow2.f32 %v1667_v29 }
 0x2fb   :  { %v1079_v34 = vpop.f32.mrb[19].mxu0  ;;  %2159 = vpow2.f32 %v1672_v28  ;;  %v1085_v11 = vadd.f32 %v1932_v32, %v2407_v13 }
 0x2fc   :  { %2161 = vpow2.f32 %v1671_v31  ;;  %v1080_v62 = vadd.f32 %v2407_v13, %v1079_v34 }
 0x2fd   :  { %2163 = vpow2.f32 %v1674_v33 }
 0x2fe   :  { %2165 = vpow2.f32 %v1673_v35 }
 0x2ff   :  { %v2152_v36 = vpop.eup %2151 }
 0x300   :  { %v1113_v37 = vadd.f32 1.0, %v2152_v36  ;;  %v2154_v38 = vpop.eup %2153 }
 0x301   :  { %v1112_v39 = vadd.f32 1.0, %v2154_v38 }
 0x302   :  { %2167 = vrcp.f32 %v1113_v37 }
 0x303   :  { %v2156_v40 = vpop.eup %2155  ;;  %2169 = vrcp.f32 %v1112_v39 }
 0x304   :  { %v1115_v41 = vadd.f32 1.0, %v2156_v40  ;;  %v2158_v42 = vpop.eup %2157 }
 0x305   :  { %v2160_v43 = vpop.eup %2159  ;;  %v1114_v44 = vadd.f32 1.0, %v2158_v42 }
 0x306   :  { %2171 = vrcp.f32 %v1115_v41  ;;  %v2162_v46 = vpop.eup %2161  ;;  %v1149_v49 = vadd.f32 1.0, %v2160_v43  ;;  %v1700_v41 = vld [vmem:[%s2697_s1 + $0x3] ss:$0 sm:$0xff] }
 0x307   :  { %2173 = vrcp.f32 %v1114_v44  ;;  %v2164_v47 = vpop.eup %2163  ;;  %v1148_v50 = vadd.f32 1.0, %v2162_v46 }
 0x308   :  { %v2166_v58 = vpop.eup %2165  ;;  %v1151_v52 = vadd.f32 1.0, %v2164_v47  ;;  %2175 = vrcp.f32 %v1149_v49 }
 0x309   :  { %v1150_v55 = vadd.f32 1.0, %v2166_v58  ;;  %2177 = vrcp.f32 %v1148_v50 }
 0x30a   :  { %2179 = vrcp.f32 %v1151_v52 }
 0x30c   :  { %v2168_v60 = vpop.eup %2167 }
 0x30d   :  { %v1163_v6 = vmul.f32 %v2168_v60, %v1075_v51  ;;  %v2170_v54 = vpop.eup %2169 }
 0x30e   :  { %v1162_v57 = vmul.f32 %v2170_v54, %v1070_v0 }
 0x30f   :  { %v1173_v56 = vadd.f32 %v1676_v3, %v1163_v6 }
 0x310   :  { %v2172_v59 = vpop.eup %2171  ;;  %v1172_v61 = vadd.f32 %v1676_v3, %v1162_v57 }
 0x311   :  { %2181 = vtanh.f32 %v1173_v56  ;;  %v1165_v12 = vmul.f32 %v2172_v59, %v1085_v11  ;;  %v2174_v18 = vpop.eup %2173 }
 0x312   :  { %2183 = vrcp.f32 %v1150_v55  ;;  %v1164_v63 = vmul.f32 %v2174_v18, %v1080_v62  ;;  %v2176_v1 = vpop.eup %2175 }
 0x313   :  { %2185 = vtanh.f32 %v1172_v61  ;;  %v1175_v5 = vadd.f32 %v1676_v3, %v1165_v12  ;;  %v2178_v2 = vpop.eup %2177  ;;  %v1181_v7 = vsub.f32 1.0, %v2176_v1  ;;  %v1189_v10 = vmul.f32 %v2176_v1, %v2507_v45 }
 0x314   :  { %v1174_v19 = vadd.f32 %v1676_v3, %v1164_v63  ;;  %v2180_v4 = vpop.eup %2179  ;;  %v1180_v16 = vsub.f32 1.0, %v2178_v2  ;;  %v1188_v24 = vmul.f32 %v2178_v2, %v2509_v48 }
 0x315   :  { %2187 = vtanh.f32 %v1175_v5  ;;  %v1183_v26 = vsub.f32 1.0, %v2180_v4  ;;  %v1191_v31 = vmul.f32 %v2180_v4, %v2527_v53 }
 0x316   :  { %2189 = vtanh.f32 %v1174_v19 }
 0x31b   :  { %v2182_v8 = vpop.eup %2181 }
 0x31c   :  { %v2184_v9 = vpop.eup %2183  ;;  %v1185_v14 = vmul.f32 %v2182_v8, %v1181_v7 }
 0x31d   :  { %v2186_v17 = vpop.eup %2185  ;;  %v1182_v30 = vsub.f32 1.0, %v2184_v9  ;;  %v1190_v33 = vmul.f32 %v2184_v9, %v2534_v21  ;;  %v1694_v21 = vld [vmem:[%s2696_s0 + $0x3] ss:$0 sm:$0xff] }
 0x31e   :  { %v1184_v23 = vmul.f32 %v2186_v17, %v1180_v16  ;;  %v2595_v25 = vadd.f32 %v1189_v10, %v1185_v14 }
 0x31f   :  { %v2188_v28 = vpop.eup %2187 }
 0x320   :  { %v2597_v29 = vadd.f32 %v1188_v24, %v1184_v23  ;;  %1678 = vst.msk [vmem:[%s2699_s6 + $0x48] sm:$0xff] %vm52_vm0, %v2595_v25  ;;  %v1187_v45 = vmul.f32 %v2188_v28, %v1183_v26  ;;  %v2190_v32 = vpop.eup %2189 }
 0x321   :  { %v1186_v48 = vmul.f32 %v2190_v32, %v1182_v30 }
 0x322   :  { %1677 = vst.msk [vmem:[%s2699_s6 + $0x40] sm:$0xff] %vm52_vm0, %v2597_v29  ;;  %1941 = vmatprep.mubr.msk.f32.mxu1 %vm52_vm0, %v2597_v29  ;;  %1955 = vmatprep.mubr.msk.f32.mxu0 %vm52_vm0, %v2597_v29  ;;  %v2615_v34 = vadd.f32 %v1191_v31, %v1187_v45  ;;  %v1706_v31 = vld [vmem:[%s2698_s2 + $0x3] ss:$0 sm:$0xff] }
 0x323   :  { %1942 = vmatmul.mubr.msk.f32.vlgmr.msra.gmra.mrb[16].mxu1 %vm52_vm0, %v2595_v25  ;;  %1956 = vmatmul.mubr.msk.f32.vlgmr.msra.gmra.mrb[20].mxu0 %vm52_vm0, %v2595_v25  ;;  %v2622_v53 = vadd.f32 %v1190_v33, %v1186_v48 }
 0x324   :  { %2066 = vmatpush3.bf16.msra.mxu1 %v2316_v15  ;;  %1680 = vst.msk [vmem:[%s2699_s6 + $0x58] sm:$0xff] %vm52_vm0, %v2615_v34 }
 0x325   :  { %2068 = vmatprep.subr.bf16.mxu1 %v2339_v20  ;;  %1679 = vst.msk [vmem:[%s2699_s6 + $0x50] sm:$0xff] %vm52_vm0, %v2622_v53  ;;  %1944 = vmatprep.mubr.msk.f32.mxu1 %vm52_vm0, %v2622_v53 }
 0x326   :  { %1958 = vmatprep.mubr.msk.f32.mxu0 %vm52_vm0, %v2622_v53 }
 0x327   :  { %1945 = vmatmul.mubr.msk.f32.gmra.mrb[18].mxu1 %vm52_vm0, %v2615_v34  ;;  %1959 = vmatmul.mubr.msk.f32.gmra.mrb[22].mxu0 %vm52_vm0, %v2615_v34 }
 0x328   :  { %2070 = vmatpush3.bf16.msra.mxu1 %v2339_v20  ;;  %1969 = vmatprep.mubr.msk.f32.mxu1 %vm52_vm0, %v2597_v29 }
 0x32b   :  { %1970 = vmatmul.mubr.msk.f32.vlgmr.msra.gmra.mrb[20].mxu1 %vm52_vm0, %v2595_v25 }
 0x32c   :  { %1972 = vmatprep.mubr.msk.f32.mxu1 %vm52_vm0, %v2622_v53 }
 0x32f   :  { %1973 = vmatmul.mubr.msk.f32.gmra.mrb[22].mxu1 %vm52_vm0, %v2615_v34 }
 0x3f6   :  { %v1943_v15 = vpop.f32.mrb[16].mxu1  ;;  %v1957_v35 = vpop.f32.mrb[20].mxu0 }
 0x3f7   :  { %v1285_v20 = vadd.f32 %v1943_v15, %v2383_v22  ;;  %v1279_v36 = vpop.f32.mrb[17].mxu1  ;;  %v1364_v37 = vpop.f32.mrb[21].mxu0  ;;  %v1370_v38 = vadd.f32 %v1957_v35, %v2392_v27 }
 0x3f8   :  { %v1280_v39 = vadd.f32 %v2383_v22, %v1279_v36  ;;  %v1365_v43 = vadd.f32 %v2392_v27, %v1364_v37 }
 0x3f9   :  { %v1477_v40 = vadd.f32 %v1694_v21, %v1285_v20  ;;  %v1513_v60 = vadd.f32 %v1700_v41, %v1370_v38 }
 0x3fa   :  { %v1476_v42 = vadd.f32 %v1694_v21, %v1280_v39  ;;  %v1946_v44 = vpop.f32.mrb[18].mxu1  ;;  %v1960_v46 = vpop.f32.mrb[22].mxu0  ;;  %v1512_v54 = vadd.f32 %v1700_v41, %v1365_v43 }
 0x3fb   :  { %v1696_v47 = vmul.f32 -1.442695, %v1477_v40  ;;  %v1295_v49 = vadd.f32 %v1946_v44, %v2383_v22  ;;  %v1380_v58 = vadd.f32 %v1960_v46, %v2392_v27  ;;  %v1289_v50 = vpop.f32.mrb[19].mxu1  ;;  %v1374_v51 = vpop.f32.mrb[23].mxu0  ;;  %v1702_v61 = vmul.f32 -1.442695, %v1513_v60 }
 0x3fc   :  { %v1695_v52 = vmul.f32 -1.442695, %v1476_v42  ;;  %v1290_v3 = vadd.f32 %v2383_v22, %v1289_v50  ;;  %v1375_v0 = vadd.f32 %v2392_v27, %v1374_v51  ;;  %v1701_v18 = vmul.f32 -1.442695, %v1512_v54 }
 0x3fd   :  { %2191 = vpow2.f32 %v1696_v47  ;;  %v1479_v6 = vadd.f32 %v1694_v21, %v1295_v49  ;;  %v1515_v11 = vadd.f32 %v1700_v41, %v1380_v58 }
 0x3fe   :  { %v1478_v55 = vadd.f32 %v1694_v21, %v1290_v3  ;;  %v1971_v56 = vpop.f32.mrb[20].mxu1  ;;  %2193 = vpow2.f32 %v1695_v52  ;;  %v1514_v62 = vadd.f32 %v1700_v41, %v1375_v0 }
 0x3ff   :  { %v1698_v57 = vmul.f32 -1.442695, %v1479_v6  ;;  %v1449_v59 = vpop.f32.mrb[21].mxu1  ;;  %v1704_v63 = vmul.f32 -1.442695, %v1515_v11  ;;  %v1455_v28 = vadd.f32 %v1971_v56, %v2407_v13 }
 0x400   :  { %v1697_v12 = vmul.f32 -1.442695, %v1478_v55  ;;  %v1703_v19 = vmul.f32 -1.442695, %v1514_v62  ;;  %v1450_v48 = vadd.f32 %v2407_v13, %v1449_v59 }
 0x401   :  { %2195 = vpow2.f32 %v1698_v57 }
 0x402   :  { %v1974_v5 = vpop.f32.mrb[22].mxu1  ;;  %2197 = vpow2.f32 %v1697_v12 }
 0x403   :  { %v1459_v22 = vpop.f32.mrb[23].mxu1  ;;  %2199 = vpow2.f32 %v1702_v61  ;;  %v1465_v20 = vadd.f32 %v1974_v5, %v2407_v13 }
 0x404   :  { %2201 = vpow2.f32 %v1701_v18  ;;  %v1460_v39 = vadd.f32 %v2407_v13, %v1459_v22 }
 0x405   :  { %2203 = vpow2.f32 %v1704_v63 }
 0x406   :  { %2205 = vpow2.f32 %v1703_v19 }
 0x407   :  { %v2192_v27 = vpop.eup %2191 }
 0x408   :  { %v1493_v1 = vadd.f32 1.0, %v2192_v27  ;;  %v2194_v2 = vpop.eup %2193 }
 0x409   :  { %v1492_v4 = vadd.f32 1.0, %v2194_v2 }
 0x40a   :  { %2207 = vrcp.f32 %v1493_v1 }
 0x40b   :  { %v2196_v7 = vpop.eup %2195  ;;  %2209 = vrcp.f32 %v1492_v4 }
 0x40c   :  { %v1495_v8 = vadd.f32 1.0, %v2196_v7  ;;  %v2198_v9 = vpop.eup %2197 }
 0x40d   :  { %v2200_v10 = vpop.eup %2199  ;;  %v1494_v14 = vadd.f32 1.0, %v2198_v9 }
 0x40e   :  { %2211 = vrcp.f32 %v1495_v8  ;;  %v2202_v16 = vpop.eup %2201  ;;  %v1529_v23 = vadd.f32 1.0, %v2200_v10 }
 0x40f   :  { %2213 = vrcp.f32 %v1494_v14  ;;  %v2204_v17 = vpop.eup %2203  ;;  %v1528_v26 = vadd.f32 1.0, %v2202_v16 }
 0x410   :  { %v2206_v24 = vpop.eup %2205  ;;  %v1531_v45 = vadd.f32 1.0, %v2204_v17  ;;  %2215 = vrcp.f32 %v1529_v23 }
 0x411   :  { %v1530_v15 = vadd.f32 1.0, %v2206_v24  ;;  %2217 = vrcp.f32 %v1528_v26 }
 0x412   :  { %2219 = vrcp.f32 %v1531_v45 }
 0x414   :  { %v2208_v30 = vpop.eup %2207 }
 0x415   :  { %v1543_v32 = vmul.f32 %v2208_v30, %v1455_v28  ;;  %v2210_v33 = vpop.eup %2209 }
 0x416   :  { %v1542_v35 = vmul.f32 %v2210_v33, %v1450_v48 }
 0x417   :  { %v1553_v21 = vadd.f32 %v1706_v31, %v1543_v32 }
 0x418   :  { %v2212_v36 = vpop.eup %2211  ;;  %v1552_v37 = vadd.f32 %v1706_v31, %v1542_v35 }
 0x419   :  { %2221 = vtanh.f32 %v1553_v21  ;;  %v1545_v38 = vmul.f32 %v2212_v36, %v1465_v20  ;;  %v2214_v40 = vpop.eup %2213 }
 0x41a   :  { %2223 = vrcp.f32 %v1530_v15  ;;  %v1544_v42 = vmul.f32 %v2214_v40, %v1460_v39  ;;  %v2216_v44 = vpop.eup %2215 }
 0x41b   :  { %2225 = vtanh.f32 %v1552_v37  ;;  %v1555_v41 = vadd.f32 %v1706_v31, %v1545_v38  ;;  %v2218_v46 = vpop.eup %2217  ;;  %v1561_v49 = vsub.f32 1.0, %v2216_v44  ;;  %v1569_v51 = vmul.f32 %v2216_v44, %v2595_v25 }
 0x41c   :  { %v1554_v43 = vadd.f32 %v1706_v31, %v1544_v42  ;;  %v2220_v47 = vpop.eup %2219  ;;  %v1560_v60 = vsub.f32 1.0, %v2218_v46  ;;  %v1568_v13 = vmul.f32 %v2218_v46, %v2597_v29 }
 0x41d   :  { %2227 = vtanh.f32 %v1555_v41  ;;  %v1563_v6 = vsub.f32 1.0, %v2220_v47  ;;  %v1571_v56 = vmul.f32 %v2220_v47, %v2615_v34 }
 0x41e   :  { %2229 = vtanh.f32 %v1554_v43 }
 0x423   :  { %v2222_v58 = vpop.eup %2221 }
 0x424   :  { %v2224_v50 = vpop.eup %2223  ;;  %v1565_v52 = vmul.f32 %v2222_v58, %v1561_v49 }
 0x425   :  { %v2226_v3 = vpop.eup %2225  ;;  %v1562_v57 = vsub.f32 1.0, %v2224_v50  ;;  %v1570_v61 = vmul.f32 %v2224_v50, %v2622_v53 }
 0x426   :  { %v1573_v0 = vadd.f32 %v1569_v51, %v1565_v52  ;;  %v1564_v54 = vmul.f32 %v2226_v3, %v1560_v60 }
 0x427   :  { %v2228_v55 = vpop.eup %2227 }
 0x428   :  { %1708 = vst.msk [vmem:[%s2699_s6 + $0x68] sm:$0xff] %vm52_vm0, %v1573_v0  ;;  %v1572_v11 = vadd.f32 %v1568_v13, %v1564_v54  ;;  %v1567_v59 = vmul.f32 %v2228_v55, %v1563_v6  ;;  %v2230_v25 = vpop.eup %2229 }
 0x429   :  { %v1566_v12 = vmul.f32 %v2230_v25, %v1562_v57 }
 0x42a   :  { %1707 = vst.msk [vmem:[%s2699_s6 + $0x60] sm:$0xff] %vm52_vm0, %v1572_v11  ;;  %v1575_v29 = vadd.f32 %v1571_v56, %v1567_v59 }
 0x42b   :  { %v1574_v34 = vadd.f32 %v1570_v61, %v1566_v12 }
 0x42c   :  { %1710 = vst.msk [vmem:[%s2699_s6 + $0x78] sm:$0xff] %vm52_vm0, %v1575_v29 }
 0x42d   :  { %1709 = vst.msk [vmem:[%s2699_s6 + $0x70] sm:$0xff] %vm52_vm0, %v1574_v34 }

</bundles_post_ra>
